<compile_context>
chip_gen: v6e
topology: v6e:2x2x1
jax: 0.10.0
libtpu: 0.0.40
codegen_flags: <defaults>
</compile_context>

<pallas_src>
import functools

import jax
import jax.numpy as jnp
from jax.experimental import pallas as pl
from jax.experimental.pallas import tpu as pltpu


def _conv_band_kernel(top_ref, mid_ref, bot_ref, w_ref, b_ref, o_ref, *,
                      Ws, TH, THs, relu, upsample):
    """One (batch, output-row-band) tile per grid step.

    top_ref/bot_ref : (1, Ws, Cin)       halo rows (border reflection folded into index maps)
    mid_ref         : (THs, Ws, Cin)     interior source rows of the band
    w_ref           : (3, ntaps*Cin, Co) bf16 weights, W taps folded into the K axis
    b_ref           : (1, Co)            f32 bias
    o_ref           : (TH, Ws, Co)       output band (batch dim squeezed)
    """
    src = jnp.concatenate([top_ref[...], mid_ref[...], bot_ref[...]], axis=0)

    if upsample:
        # Nearest-2x along H fused: duplicate interior source rows (outer-dim repeat).
        window = jnp.concatenate(
            [src[0:1], jnp.repeat(src[1:THs + 1], 2, axis=0), src[THs + 1:THs + 2]],
            axis=0)                                                    # (TH+2, Ws, Cin)
        # W neighbours on the SOURCE grid; reflection on the upsampled grid
        # becomes edge replication on the source grid.
        left = jnp.concatenate([window[:, 0:1], window[:, :Ws - 1]], axis=1)
        right = jnp.concatenate([window[:, 1:], window[:, Ws - 1:Ws]], axis=1)
        # Even output cols use taps (left, x, x), odd cols (x, x, right); the
        # centre column is kept twice so every bf16 tap stays a separate MXU
        # product (exact tap-level match with an unfused conv).
        xcat = jnp.concatenate([left, window, window, right], axis=2)  # (TH+2, Ws, 4*Cin)
    else:
        window = src                                                   # (TH+2, Ws, Cin)
        left = jnp.concatenate([window[:, 1:2], window[:, :Ws - 1]], axis=1)
        right = jnp.concatenate([window[:, 1:], window[:, Ws - 2:Ws - 1]], axis=1)
        xcat = jnp.concatenate([left, window, right], axis=2)          # (TH+2, Ws, 3*Cin)

    K = xcat.shape[-1]
    Co = o_ref.shape[-1]
    # 3 MXU matmuls (one per dy tap), f32 accumulation.
    acc = jnp.dot(xcat[0:TH].reshape(TH * Ws, K), w_ref[0],
                  preferred_element_type=jnp.float32)
    acc = acc + jnp.dot(xcat[1:TH + 1].reshape(TH * Ws, K), w_ref[1],
                        preferred_element_type=jnp.float32)
    acc = acc + jnp.dot(xcat[2:TH + 2].reshape(TH * Ws, K), w_ref[2],
                        preferred_element_type=jnp.float32)
    acc = acc + b_ref[...]
    if relu:
        acc = jnp.maximum(acc, 0.0)
    o_ref[...] = acc.reshape(TH, Ws, Co).astype(o_ref.dtype)


@functools.lru_cache(maxsize=1)
def _vmem_capacity_bytes():
    try:
        info = pltpu.get_tpu_info()
        for name in ("vmem_capacity_bytes", "vmem_size_bytes", "vmem_bytes"):
            cap = getattr(info, name, None)
            if cap:
                return int(cap)
    except Exception:
        pass
    return 64 * 1024 * 1024        # conservative default: v7x has 64 MiB per TC


def _band_vmem_bytes(th, ths, Ws, Cin, Co, ntaps, out_itemsize):
    a = 2                                              # bf16 activations
    stream_in = 2 * (ths + 2) * Ws * Cin * a           # double-buffered input blocks
    window = (th + 2) * Ws * Cin * a
    shifts = 2 * (th + 2) * Ws * Cin * a               # left / right temporaries
    xcat = (th + 2) * Ws * ntaps * Cin * a
    lhs_copies = 2 * th * Ws * ntaps * Cin * a         # sliced-reshape rematerialisation
    acc = 2 * th * Ws * Co * 4
    out_blk = 2 * th * Ws * Co * out_itemsize
    wts = 2 * (3 * ntaps * Cin * Co * a + Co * 4)
    return stream_in + window + shifts + xcat + lhs_copies + acc + out_blk + wts


def _pick_band_rows(Ho, Ws, Cin, Co, ntaps, out_itemsize, *, upsample, n_batch,
                    budget, max_rows, min_grid_steps=4):
    """Largest output-row band whose footprint fits `budget`, preferring bands
    that keep >= min_grid_steps grid steps (megacore sharding + pipelining)."""
    fits = []
    for th in range(1, Ho + 1):
        if Ho % th:
            continue
        if upsample and th % 2:
            continue
        ths = th // 2 if upsample else th
        if _band_vmem_bytes(th, ths, Ws, Cin, Co, ntaps, out_itemsize) <= budget:
            fits.append(th)
    if not fits:
        return 2 if upsample else 1
    pref = [t for t in fits if t <= max_rows and n_batch * (Ho // t) >= min_grid_steps]
    if pref:
        return max(pref)
    pref = [t for t in fits if t <= max_rows]
    if pref:
        return max(pref)
    return min(fits)


def _conv_layer(x_nhwc, wcat, bias, *, relu, upsample, out_dtype, max_rows=64):
    """ReflectionPad2d(1) + Conv2d(3x3, stride 1) [+ fused nearest-2x up] [+ ReLU].

    x_nhwc : (N, Hs, Ws, Cin) bf16.
    wcat   : (3, ntaps*Cin, Co) bf16 with W taps folded into K.  For the fused
             upsample layer ntaps=4 and Co=2*Cout (even|odd output columns);
             otherwise ntaps=3, Co=Cout.
    Returns (N, Ho, Ws, Co), Ho = 2*Hs if upsample else Hs.
    """
    N, Hs, Ws, Cin = x_nhwc.shape
    Co = wcat.shape[-1]
    ntaps = wcat.shape[1] // Cin
    Ho = 2 * Hs if upsample else Hs
    assert Hs >= 2 and Ws >= 2, "reflection pad of 1 needs spatial dims >= 2"

    cap = _vmem_capacity_bytes()
    budget = 3 * cap // 8
    out_isz = jnp.dtype(out_dtype).itemsize
    TH = _pick_band_rows(Ho, Ws, Cin, Co, ntaps, out_isz, upsample=upsample,
                         n_batch=N, budget=budget, max_rows=max_rows)
    THs = TH // 2 if upsample else TH
    nb = Ho // TH
    est = _band_vmem_bytes(TH, THs, Ws, Cin, Co, ntaps, out_isz)
    vmem_limit = int(min(cap * 3 // 4, max(32 * 1024 * 1024, est + est // 2)))

    # Halo row index maps: border reflection folded into scalar index arithmetic.
    if upsample:
        top_map = lambda n, i: (n, jnp.maximum(i * THs - 1, 0), 0, 0)
        bot_map = lambda n, i: (n, jnp.minimum(i * THs + THs, Hs - 1), 0, 0)
    else:
        top_map = lambda n, i: (n, jnp.abs(i * TH - 1), 0, 0)
        bot_map = lambda n, i: (n, (Hs - 1) - jnp.abs(Hs - 1 - (i * TH + TH)), 0, 0)

    kernel = functools.partial(_conv_band_kernel, Ws=Ws, TH=TH, THs=THs,
                               relu=relu, upsample=upsample)
    return pl.pallas_call(
        kernel,
        out_shape=jax.ShapeDtypeStruct((N, Ho, Ws, Co), out_dtype),
        grid=(N, nb),
        in_specs=[
            pl.BlockSpec((None, 1, Ws, Cin), top_map),                       # top halo row
            pl.BlockSpec((None, THs, Ws, Cin), lambda n, i: (n, i, 0, 0)),   # interior rows
            pl.BlockSpec((None, 1, Ws, Cin), bot_map),                       # bottom halo row
            pl.BlockSpec((3, ntaps * Cin, Co), lambda n, i: (0, 0, 0)),      # resident weights
            pl.BlockSpec((1, Co), lambda n, i: (0, 0)),                      # bias
        ],
        out_specs=pl.BlockSpec((None, TH, Ws, Co), lambda n, i: (n, i, 0, 0)),
        compiler_params=pltpu.CompilerParams(
            dimension_semantics=("parallel", "parallel"),
            vmem_limit_bytes=vmem_limit,
        ),
    )(x_nhwc, x_nhwc, x_nhwc, wcat, bias)


def _prep_plain_weights(w_hwio, b):
    Cin, Co = w_hwio.shape[2], w_hwio.shape[3]
    wcat = w_hwio.astype(jnp.bfloat16).reshape(3, 3 * Cin, Co)
    return wcat, b.astype(jnp.float32).reshape(1, Co)


def _prep_upsample_weights(w_hwio, b):
    # Fold the W-direction nearest-2x upsample into the weights: even output
    # columns use taps (x[m-1], x[m], x[m]); odd columns (x[m], x[m], x[m+1]).
    # K blocks follow the kernel's xcat order [left, x, x, right].
    w = w_hwio.astype(jnp.bfloat16)
    zero = jnp.zeros_like(w[:, 0])
    even = jnp.concatenate([w[:, 0], w[:, 1], w[:, 2], zero], axis=1)   # (3, 4*Cin, Co)
    odd = jnp.concatenate([zero, w[:, 0], w[:, 1], w[:, 2]], axis=1)
    wcat = jnp.concatenate([even, odd], axis=2)                          # (3, 4*Cin, 2*Co)
    b2 = jnp.concatenate([b, b]).astype(jnp.float32).reshape(1, -1)
    return wcat, b2


def decoder2_forward(x_nchw, params, *, max_rows=64):
    """Matches decoder2.forward. Input/output are NCHW like PyTorch; weights are
    HWIO (from PyTorch OIHW: transpose (2, 3, 1, 0))."""
    x = jnp.transpose(x_nchw, (0, 2, 3, 1)).astype(jnp.bfloat16)          # NCHW -> NHWC, bf16
    w5, b5 = _prep_plain_weights(params["w5"], params["b5"])
    y5 = _conv_layer(x, w5, b5, relu=True, upsample=False,
                     out_dtype=jnp.bfloat16, max_rows=max_rows)            # 128 -> 64 @ HxW
    w6, b6 = _prep_upsample_weights(params["w6"], params["b6"])
    y6 = _conv_layer(y5, w6, b6, relu=True, upsample=True,
                     out_dtype=jnp.bfloat16, max_rows=max_rows)            # fused 2x up, 64 -> 64
    N, Ho, Wsrc, C2 = y6.shape
    y6 = y6.reshape(N, Ho, 2 * Wsrc, C2 // 2)       # free: identical row-major layout
    w7, b7 = _prep_plain_weights(params["w7"], params["b7"])
    y7 = _conv_layer(y6, w7, b7, relu=False, upsample=False,
                     out_dtype=jnp.float32, max_rows=max_rows)             # 64 -> 3 @ 2Hx2W
    return jnp.transpose(y7, (0, 3, 1, 2))                                 # NHWC -> NCHW


# ------------------- pure-JAX reference (bf16-matched, for checking) -------------------
def _ref_conv3x3_reflect(x_nhwc, w_hwio, b, apply_relu):
    xb = x_nhwc.astype(jnp.bfloat16).astype(jnp.float32)
    wb = w_hwio.astype(jnp.bfloat16).astype(jnp.float32)
    xp = jnp.pad(xb, ((0, 0), (1, 1), (1, 1), (0, 0)), mode="reflect")
    y = jax.lax.conv_general_dilated(
        xp, wb, window_strides=(1, 1), padding="VALID",
        dimension_numbers=("NHWC", "HWIO", "NHWC"),
        precision=jax.lax.Precision.HIGHEST)
    y = y + b[None, None, None, :].astype(jnp.float32)
    return jnp.maximum(y, 0.0) if apply_relu else y


def decoder2_reference(x_nchw, params):
    x = jnp.transpose(x_nchw, (0, 2, 3, 1))
    x = _ref_conv3x3_reflect(x, params["w5"], params["b5"], True).astype(jnp.bfloat16)
    x = jnp.repeat(jnp.repeat(x, 2, axis=1), 2, axis=2)
    x = _ref_conv3x3_reflect(x, params["w6"], params["b6"], True).astype(jnp.bfloat16)
    x = _ref_conv3x3_reflect(x, params["w7"], params["b7"], False)
    return jnp.transpose(x, (0, 3, 1, 2))


if __name__ == "__main__":
    key = jax.random.PRNGKey(0)
    k_x, k5w, k5b, k6w, k6b, k7w, k7b = jax.random.split(key, 7)

    # Small shapes consistent with the module: Conv2d(128, 64, 3) first layer.
    N, Cin, H, W = 2, 128, 8, 8
    x = jax.random.normal(k_x, (N, Cin, H, W), dtype=jnp.float32)

    # Synthetic weights in HWIO (PyTorch OIHW shapes: (64,128,3,3), (64,64,3,3), (3,64,3,3)).
    params = {
        "w5": 0.05 * jax.random.normal(k5w, (3, 3, 128, 64), dtype=jnp.float32),
        "b5": 0.05 * jax.random.normal(k5b, (64,), dtype=jnp.float32),
        "w6": 0.05 * jax.random.normal(k6w, (3, 3, 64, 64), dtype=jnp.float32),
        "b6": 0.05 * jax.random.normal(k6b, (64,), dtype=jnp.float32),
        "w7": 0.05 * jax.random.normal(k7w, (3, 3, 64, 3), dtype=jnp.float32),
        "b7": 0.05 * jax.random.normal(k7b, (3,), dtype=jnp.float32),
    }

    fwd = jax.jit(decoder2_forward, static_argnames=("max_rows",))
    ref_fn = jax.jit(decoder2_reference)

    out = jax.block_until_ready(fwd(x, params))
    ref = jax.block_until_ready(ref_fn(x, params))
    assert out.shape == (N, 3, 2 * H, 2 * W), out.shape
    err = float(jnp.max(jnp.abs(out - ref)))
    assert err < 3e-2, f"default-band path max abs err {err}"

    # Force tiny row bands to also exercise the multi-band halo/index-map path.
    out_mb = jax.block_until_ready(fwd(x, params, max_rows=2))
    err_mb = float(jnp.max(jnp.abs(out_mb - ref)))
    assert err_mb < 3e-2, f"multi-band path max abs err {err_mb}"

    print("KERNEL_OK")
</pallas_src>

<mosaic_0001>
module attributes {stable_mosaic.version = 11 : i64} {
  func.func @_conv_band_kernel(%arg0: i32, %arg1: i32, %arg2: memref<1x1x8x128xbf16, #tpu.memory_space<vmem>>, %arg3: memref<1x4x8x128xbf16, #tpu.memory_space<vmem>>, %arg4: memref<1x1x8x128xbf16, #tpu.memory_space<vmem>>, %arg5: memref<3x384x64xbf16, #tpu.memory_space<vmem>>, %arg6: memref<1x64xf32, #tpu.memory_space<vmem>>, %arg7: memref<1x4x8x64xbf16, #tpu.memory_space<vmem>>) attributes {dimension_semantics = [#tpu.dimension_semantics<parallel>, #tpu.dimension_semantics<parallel>], iteration_bounds = array<i64: 2, 2>, scalar_prefetch = 0 : i64, scratch_operands = 0 : i64, tpu.core_type = #tpu.core_type<tc>, window_params = [{transform_indices = @transform_0, window_bounds = array<i64: 1, 1, 8, 128>}, {transform_indices = @transform_1, window_bounds = array<i64: 1, 4, 8, 128>}, {transform_indices = @transform_2, window_bounds = array<i64: 1, 1, 8, 128>}, {pipeline_mode = #tpu.pipeline_mode<synchronous>, transform_indices = @transform_3, window_bounds = array<i64: 3, 384, 64>}, {pipeline_mode = #tpu.pipeline_mode<synchronous>, transform_indices = @transform_4, window_bounds = array<i64: 1, 64>}, {transform_indices = @transform_5, window_bounds = array<i64: 1, 4, 8, 64>}]} {
    %c0 = arith.constant 0 : index
    %c0_0 = arith.constant 0 : index
    %c0_1 = arith.constant 0 : index
    %c0_2 = arith.constant 0 : index
    %0 = vector.load %arg2[%c0, %c0_0, %c0_1, %c0_2] : memref<1x1x8x128xbf16, #tpu.memory_space<vmem>>, vector<1x1x8x128xbf16>
    %1 = vector.shape_cast %0 : vector<1x1x8x128xbf16> to vector<1x8x128xbf16>
    %c0_3 = arith.constant 0 : index
    %c0_4 = arith.constant 0 : index
    %c0_5 = arith.constant 0 : index
    %c0_6 = arith.constant 0 : index
    %2 = vector.load %arg3[%c0_3, %c0_4, %c0_5, %c0_6] : memref<1x4x8x128xbf16, #tpu.memory_space<vmem>>, vector<1x4x8x128xbf16>
    %3 = vector.shape_cast %2 : vector<1x4x8x128xbf16> to vector<4x8x128xbf16>
    %c0_7 = arith.constant 0 : index
    %c0_8 = arith.constant 0 : index
    %c0_9 = arith.constant 0 : index
    %c0_10 = arith.constant 0 : index
    %4 = vector.load %arg4[%c0_7, %c0_8, %c0_9, %c0_10] : memref<1x1x8x128xbf16, #tpu.memory_space<vmem>>, vector<1x1x8x128xbf16>
    %5 = vector.shape_cast %4 : vector<1x1x8x128xbf16> to vector<1x8x128xbf16>
    %6 = tpu.concatenate %1, %3, %5 in 0 : vector<1x8x128xbf16>, vector<4x8x128xbf16>, vector<1x8x128xbf16> -> vector<6x8x128xbf16>
    %7 = vector.extract_strided_slice %6 {offsets = [0, 1, 0], sizes = [6, 1, 128], strides = [1, 1, 1]} : vector<6x8x128xbf16> to vector<6x1x128xbf16>
    %8 = vector.extract_strided_slice %6 {offsets = [0, 0, 0], sizes = [6, 7, 128], strides = [1, 1, 1]} : vector<6x8x128xbf16> to vector<6x7x128xbf16>
    %9 = tpu.concatenate %7, %8 in 1 : vector<6x1x128xbf16>, vector<6x7x128xbf16> -> vector<6x8x128xbf16>
    %10 = vector.extract_strided_slice %6 {offsets = [0, 1, 0], sizes = [6, 7, 128], strides = [1, 1, 1]} : vector<6x8x128xbf16> to vector<6x7x128xbf16>
    %11 = vector.extract_strided_slice %6 {offsets = [0, 6, 0], sizes = [6, 1, 128], strides = [1, 1, 1]} : vector<6x8x128xbf16> to vector<6x1x128xbf16>
    %12 = tpu.concatenate %10, %11 in 1 : vector<6x7x128xbf16>, vector<6x1x128xbf16> -> vector<6x8x128xbf16>
    %13 = tpu.concatenate %9, %6, %12 in 2 : vector<6x8x128xbf16>, vector<6x8x128xbf16>, vector<6x8x128xbf16> -> vector<6x8x384xbf16>
    %14 = vector.extract_strided_slice %13 {offsets = [0, 0, 0], sizes = [4, 8, 384], strides = [1, 1, 1]} : vector<6x8x384xbf16> to vector<4x8x384xbf16>
    %15 = vector.shape_cast %14 : vector<4x8x384xbf16> to vector<32x384xbf16>
    %c0_11 = arith.constant 0 : index
    %c0_12 = arith.constant 0 : index
    %c0_13 = arith.constant 0 : index
    %16 = vector.load %arg5[%c0_11, %c0_12, %c0_13] : memref<3x384x64xbf16, #tpu.memory_space<vmem>>, vector<1x384x64xbf16>
    %17 = vector.shape_cast %16 : vector<1x384x64xbf16> to vector<384x64xbf16>
    %cst = arith.constant dense<0.000000e+00> : vector<32x64xf32>
    %18 = tpu.matmul %15, %17, %cst {dimension_numbers = #tpu.dot_dimension_numbers<[1], [0], [0], [1], [0, 0, 1, 1], [], []>} : vector<32x384xbf16>, vector<384x64xbf16>, vector<32x64xf32> -> vector<32x64xf32>
    %19 = vector.extract_strided_slice %13 {offsets = [1, 0, 0], sizes = [4, 8, 384], strides = [1, 1, 1]} : vector<6x8x384xbf16> to vector<4x8x384xbf16>
    %20 = vector.shape_cast %19 : vector<4x8x384xbf16> to vector<32x384xbf16>
    %c1 = arith.constant 1 : index
    %c0_14 = arith.constant 0 : index
    %c0_15 = arith.constant 0 : index
    %21 = vector.load %arg5[%c1, %c0_14, %c0_15] : memref<3x384x64xbf16, #tpu.memory_space<vmem>>, vector<1x384x64xbf16>
    %22 = vector.shape_cast %21 : vector<1x384x64xbf16> to vector<384x64xbf16>
    %cst_16 = arith.constant dense<0.000000e+00> : vector<32x64xf32>
    %23 = tpu.matmul %20, %22, %cst_16 {dimension_numbers = #tpu.dot_dimension_numbers<[1], [0], [0], [1], [0, 0, 1, 1], [], []>} : vector<32x384xbf16>, vector<384x64xbf16>, vector<32x64xf32> -> vector<32x64xf32>
    %24 = arith.addf %18, %23 : vector<32x64xf32>
    %25 = vector.extract_strided_slice %13 {offsets = [2, 0, 0], sizes = [4, 8, 384], strides = [1, 1, 1]} : vector<6x8x384xbf16> to vector<4x8x384xbf16>
    %26 = vector.shape_cast %25 : vector<4x8x384xbf16> to vector<32x384xbf16>
    %c2 = arith.constant 2 : index
    %c0_17 = arith.constant 0 : index
    %c0_18 = arith.constant 0 : index
    %27 = vector.load %arg5[%c2, %c0_17, %c0_18] : memref<3x384x64xbf16, #tpu.memory_space<vmem>>, vector<1x384x64xbf16>
    %28 = vector.shape_cast %27 : vector<1x384x64xbf16> to vector<384x64xbf16>
    %cst_19 = arith.constant dense<0.000000e+00> : vector<32x64xf32>
    %29 = tpu.matmul %26, %28, %cst_19 {dimension_numbers = #tpu.dot_dimension_numbers<[1], [0], [0], [1], [0, 0, 1, 1], [], []>} : vector<32x384xbf16>, vector<384x64xbf16>, vector<32x64xf32> -> vector<32x64xf32>
    %30 = arith.addf %24, %29 : vector<32x64xf32>
    %c0_20 = arith.constant 0 : index
    %c0_21 = arith.constant 0 : index
    %31 = vector.load %arg6[%c0_20, %c0_21] : memref<1x64xf32, #tpu.memory_space<vmem>>, vector<1x64xf32>
    %32 = vector.broadcast %31 : vector<1x64xf32> to vector<32x64xf32>
    %33 = arith.addf %30, %32 : vector<32x64xf32>
    %cst_22 = arith.constant 0.000000e+00 : f32
    %34 = vector.broadcast %cst_22 : f32 to vector<32x64xf32>
    %35 = arith.maximumf %33, %34 : vector<32x64xf32>
    %36 = vector.shape_cast %35 : vector<32x64xf32> to vector<4x8x64xf32>
    %37 = arith.truncf %36 : vector<4x8x64xf32> to vector<4x8x64xbf16>
    %c0_23 = arith.constant 0 : index
    %c0_24 = arith.constant 0 : index
    %c0_25 = arith.constant 0 : index
    %c0_26 = arith.constant 0 : index
    %38 = vector.load %arg7[%c0_23, %c0_24, %c0_25, %c0_26] : memref<1x4x8x64xbf16, #tpu.memory_space<vmem>>, vector<1x4x8x64xbf16>
    %39 = vector.shape_cast %38 : vector<1x4x8x64xbf16> to vector<4x8x64xbf16>
    %40 = vector.shape_cast %37 : vector<4x8x64xbf16> to vector<1x4x8x64xbf16>
    tpu.vector_store %arg7[%c0_23, %c0_24, %c0_25, %c0_26], %40 {strides = array<i32>} : memref<1x4x8x64xbf16, #tpu.memory_space<vmem>>, vector<1x4x8x64xbf16>,
    return
  }
  func.func @transform_0(%arg0: i32, %arg1: i32) -> (i32, i32, i32, i32) {
    %c4_i32 = arith.constant 4 : i32
    %0 = arith.muli %arg1, %c4_i32 : i32
    %c1_i32 = arith.constant 1 : i32
    %1 = arith.subi %0, %c1_i32 : i32
    %2 = math.absi %1 : i32
    %c0_i32 = arith.constant 0 : i32
    %c0_i32_0 = arith.constant 0 : i32
    %c0_i32_1 = arith.constant 0 : i32
    return %arg0, %2, %c0_i32, %c0_i32_0 : i32, i32, i32, i32
  }
  func.func @transform_1(%arg0: i32, %arg1: i32) -> (i32, i32, i32, i32) {
    %c0_i32 = arith.constant 0 : i32
    %c0_i32_0 = arith.constant 0 : i32
    %c0_i32_1 = arith.constant 0 : i32
    return %arg0, %arg1, %c0_i32, %c0_i32_0 : i32, i32, i32, i32
  }
  func.func @transform_2(%arg0: i32, %arg1: i32) -> (i32, i32, i32, i32) {
    %c4_i32 = arith.constant 4 : i32
    %0 = arith.muli %arg1, %c4_i32 : i32
    %c4_i32_0 = arith.constant 4 : i32
    %1 = arith.addi %0, %c4_i32_0 : i32
    %c7_i32 = arith.constant 7 : i32
    %2 = arith.subi %c7_i32, %1 : i32
    %3 = math.absi %2 : i32
    %c7_i32_1 = arith.constant 7 : i32
    %4 = arith.subi %c7_i32_1, %3 : i32
    %c0_i32 = arith.constant 0 : i32
    %c0_i32_2 = arith.constant 0 : i32
    %c0_i32_3 = arith.constant 0 : i32
    return %arg0, %4, %c0_i32, %c0_i32_2 : i32, i32, i32, i32
  }
  func.func @transform_3(%arg0: i32, %arg1: i32) -> (i32, i32, i32) {
    %c0_i32 = arith.constant 0 : i32
    %c0_i32_0 = arith.constant 0 : i32
    %c0_i32_1 = arith.constant 0 : i32
    %c0_i32_2 = arith.constant 0 : i32
    return %c0_i32, %c0_i32_0, %c0_i32_1 : i32, i32, i32
  }
  func.func @transform_4(%arg0: i32, %arg1: i32) -> (i32, i32) {
    %c0_i32 = arith.constant 0 : i32
    %c0_i32_0 = arith.constant 0 : i32
    %c0_i32_1 = arith.constant 0 : i32
    return %c0_i32, %c0_i32_0 : i32, i32
  }
  func.func @transform_5(%arg0: i32, %arg1: i32) -> (i32, i32, i32, i32) {
    %c0_i32 = arith.constant 0 : i32
    %c0_i32_0 = arith.constant 0 : i32
    %c0_i32_1 = arith.constant 0 : i32
    return %arg0, %arg1, %c0_i32, %c0_i32_0 : i32, i32, i32, i32
  }
}

module attributes {stable_mosaic.version = 11 : i64} {
  func.func @_conv_band_kernel(%arg0: i32, %arg1: i32, %arg2: memref<1x1x8x64xbf16, #tpu.memory_space<vmem>>, %arg3: memref<1x4x8x64xbf16, #tpu.memory_space<vmem>>, %arg4: memref<1x1x8x64xbf16, #tpu.memory_space<vmem>>, %arg5: memref<3x256x128xbf16, #tpu.memory_space<vmem>>, %arg6: memref<1x128xf32, #tpu.memory_space<vmem>>, %arg7: memref<1x8x8x128xbf16, #tpu.memory_space<vmem>>) attributes {dimension_semantics = [#tpu.dimension_semantics<parallel>, #tpu.dimension_semantics<parallel>], iteration_bounds = array<i64: 2, 2>, scalar_prefetch = 0 : i64, scratch_operands = 0 : i64, tpu.core_type = #tpu.core_type<tc>, window_params = [{transform_indices = @transform_0, window_bounds = array<i64: 1, 1, 8, 64>}, {transform_indices = @transform_1, window_bounds = array<i64: 1, 4, 8, 64>}, {transform_indices = @transform_2, window_bounds = array<i64: 1, 1, 8, 64>}, {pipeline_mode = #tpu.pipeline_mode<synchronous>, transform_indices = @transform_3, window_bounds = array<i64: 3, 256, 128>}, {pipeline_mode = #tpu.pipeline_mode<synchronous>, transform_indices = @transform_4, window_bounds = array<i64: 1, 128>}, {transform_indices = @transform_5, window_bounds = array<i64: 1, 8, 8, 128>}]} {
    %c0 = arith.constant 0 : index
    %c0_0 = arith.constant 0 : index
    %c0_1 = arith.constant 0 : index
    %c0_2 = arith.constant 0 : index
    %0 = vector.load %arg2[%c0, %c0_0, %c0_1, %c0_2] : memref<1x1x8x64xbf16, #tpu.memory_space<vmem>>, vector<1x1x8x64xbf16>
    %1 = vector.shape_cast %0 : vector<1x1x8x64xbf16> to vector<1x8x64xbf16>
    %c0_3 = arith.constant 0 : index
    %c0_4 = arith.constant 0 : index
    %c0_5 = arith.constant 0 : index
    %c0_6 = arith.constant 0 : index
    %2 = vector.load %arg3[%c0_3, %c0_4, %c0_5, %c0_6] : memref<1x4x8x64xbf16, #tpu.memory_space<vmem>>, vector<1x4x8x64xbf16>
    %3 = vector.shape_cast %2 : vector<1x4x8x64xbf16> to vector<4x8x64xbf16>
    %c0_7 = arith.constant 0 : index
    %c0_8 = arith.constant 0 : index
    %c0_9 = arith.constant 0 : index
    %c0_10 = arith.constant 0 : index
    %4 = vector.load %arg4[%c0_7, %c0_8, %c0_9, %c0_10] : memref<1x1x8x64xbf16, #tpu.memory_space<vmem>>, vector<1x1x8x64xbf16>
    %5 = vector.shape_cast %4 : vector<1x1x8x64xbf16> to vector<1x8x64xbf16>
    %6 = tpu.concatenate %1, %3, %5 in 0 : vector<1x8x64xbf16>, vector<4x8x64xbf16>, vector<1x8x64xbf16> -> vector<6x8x64xbf16>
    %7 = vector.extract_strided_slice %6 {offsets = [0, 0, 0], sizes = [1, 8, 64], strides = [1, 1, 1]} : vector<6x8x64xbf16> to vector<1x8x64xbf16>
    %8 = vector.extract_strided_slice %6 {offsets = [1, 0, 0], sizes = [4, 8, 64], strides = [1, 1, 1]} : vector<6x8x64xbf16> to vector<4x8x64xbf16>
    %9 = vector.shape_cast %8 : vector<4x8x64xbf16> to vector<4x1x8x64xbf16>
    %10 = vector.broadcast %9 : vector<4x1x8x64xbf16> to vector<4x2x8x64xbf16>
    %11 = vector.shape_cast %10 : vector<4x2x8x64xbf16> to vector<8x8x64xbf16>
    %12 = vector.extract_strided_slice %6 {offsets = [5, 0, 0], sizes = [1, 8, 64], strides = [1, 1, 1]} : vector<6x8x64xbf16> to vector<1x8x64xbf16>
    %13 = tpu.concatenate %7, %11, %12 in 0 : vector<1x8x64xbf16>, vector<8x8x64xbf16>, vector<1x8x64xbf16> -> vector<10x8x64xbf16>
    %14 = vector.extract_strided_slice %13 {offsets = [0, 0, 0], sizes = [10, 1, 64], strides = [1, 1, 1]} : vector<10x8x64xbf16> to vector<10x1x64xbf16>
    %15 = vector.extract_strided_slice %13 {offsets = [0, 0, 0], sizes = [10, 7, 64], strides = [1, 1, 1]} : vector<10x8x64xbf16> to vector<10x7x64xbf16>
    %16 = tpu.concatenate %14, %15 in 1 : vector<10x1x64xbf16>, vector<10x7x64xbf16> -> vector<10x8x64xbf16>
    %17 = vector.extract_strided_slice %13 {offsets = [0, 1, 0], sizes = [10, 7, 64], strides = [1, 1, 1]} : vector<10x8x64xbf16> to vector<10x7x64xbf16>
    %18 = vector.extract_strided_slice %13 {offsets = [0, 7, 0], sizes = [10, 1, 64], strides = [1, 1, 1]} : vector<10x8x64xbf16> to vector<10x1x64xbf16>
    %19 = tpu.concatenate %17, %18 in 1 : vector<10x7x64xbf16>, vector<10x1x64xbf16> -> vector<10x8x64xbf16>
    %20 = tpu.concatenate %16, %13, %13, %19 in 2 : vector<10x8x64xbf16>, vector<10x8x64xbf16>, vector<10x8x64xbf16>, vector<10x8x64xbf16> -> vector<10x8x256xbf16>
    %21 = vector.extract_strided_slice %20 {offsets = [0, 0, 0], sizes = [8, 8, 256], strides = [1, 1, 1]} : vector<10x8x256xbf16> to vector<8x8x256xbf16>
    %22 = vector.shape_cast %21 : vector<8x8x256xbf16> to vector<64x256xbf16>
    %c0_11 = arith.constant 0 : index
    %c0_12 = arith.constant 0 : index
    %c0_13 = arith.constant 0 : index
    %23 = vector.load %arg5[%c0_11, %c0_12, %c0_13] : memref<3x256x128xbf16, #tpu.memory_space<vmem>>, vector<1x256x128xbf16>
    %24 = vector.shape_cast %23 : vector<1x256x128xbf16> to vector<256x128xbf16>
    %cst = arith.constant dense<0.000000e+00> : vector<64x128xf32>
    %25 = tpu.matmul %22, %24, %cst {dimension_numbers = #tpu.dot_dimension_numbers<[1], [0], [0], [1], [0, 0, 1, 1], [], []>} : vector<64x256xbf16>, vector<256x128xbf16>, vector<64x128xf32> -> vector<64x128xf32>
    %26 = vector.extract_strided_slice %20 {offsets = [1, 0, 0], sizes = [8, 8, 256], strides = [1, 1, 1]} : vector<10x8x256xbf16> to vector<8x8x256xbf16>
    %27 = vector.shape_cast %26 : vector<8x8x256xbf16> to vector<64x256xbf16>
    %c1 = arith.constant 1 : index
    %c0_14 = arith.constant 0 : index
    %c0_15 = arith.constant 0 : index
    %28 = vector.load %arg5[%c1, %c0_14, %c0_15] : memref<3x256x128xbf16, #tpu.memory_space<vmem>>, vector<1x256x128xbf16>
    %29 = vector.shape_cast %28 : vector<1x256x128xbf16> to vector<256x128xbf16>
    %cst_16 = arith.constant dense<0.000000e+00> : vector<64x128xf32>
    %30 = tpu.matmul %27, %29, %cst_16 {dimension_numbers = #tpu.dot_dimension_numbers<[1], [0], [0], [1], [0, 0, 1, 1], [], []>} : vector<64x256xbf16>, vector<256x128xbf16>, vector<64x128xf32> -> vector<64x128xf32>
    %31 = arith.addf %25, %30 : vector<64x128xf32>
    %32 = vector.extract_strided_slice %20 {offsets = [2, 0, 0], sizes = [8, 8, 256], strides = [1, 1, 1]} : vector<10x8x256xbf16> to vector<8x8x256xbf16>
    %33 = vector.shape_cast %32 : vector<8x8x256xbf16> to vector<64x256xbf16>
    %c2 = arith.constant 2 : index
    %c0_17 = arith.constant 0 : index
    %c0_18 = arith.constant 0 : index
    %34 = vector.load %arg5[%c2, %c0_17, %c0_18] : memref<3x256x128xbf16, #tpu.memory_space<vmem>>, vector<1x256x128xbf16>
    %35 = vector.shape_cast %34 : vector<1x256x128xbf16> to vector<256x128xbf16>
    %cst_19 = arith.constant dense<0.000000e+00> : vector<64x128xf32>
    %36 = tpu.matmul %33, %35, %cst_19 {dimension_numbers = #tpu.dot_dimension_numbers<[1], [0], [0], [1], [0, 0, 1, 1], [], []>} : vector<64x256xbf16>, vector<256x128xbf16>, vector<64x128xf32> -> vector<64x128xf32>
    %37 = arith.addf %31, %36 : vector<64x128xf32>
    %c0_20 = arith.constant 0 : index
    %c0_21 = arith.constant 0 : index
    %38 = vector.load %arg6[%c0_20, %c0_21] : memref<1x128xf32, #tpu.memory_space<vmem>>, vector<1x128xf32>
    %39 = vector.broadcast %38 : vector<1x128xf32> to vector<64x128xf32>
    %40 = arith.addf %37, %39 : vector<64x128xf32>
    %cst_22 = arith.constant 0.000000e+00 : f32
    %41 = vector.broadcast %cst_22 : f32 to vector<64x128xf32>
    %42 = arith.maximumf %40, %41 : vector<64x128xf32>
    %43 = vector.shape_cast %42 : vector<64x128xf32> to vector<8x8x128xf32>
    %44 = arith.truncf %43 : vector<8x8x128xf32> to vector<8x8x128xbf16>
    %c0_23 = arith.constant 0 : index
    %c0_24 = arith.constant 0 : index
    %c0_25 = arith.constant 0 : index
    %c0_26 = arith.constant 0 : index
    %45 = vector.load %arg7[%c0_23, %c0_24, %c0_25, %c0_26] : memref<1x8x8x128xbf16, #tpu.memory_space<vmem>>, vector<1x8x8x128xbf16>
    %46 = vector.shape_cast %45 : vector<1x8x8x128xbf16> to vector<8x8x128xbf16>
    %47 = vector.shape_cast %44 : vector<8x8x128xbf16> to vector<1x8x8x128xbf16>
    tpu.vector_store %arg7[%c0_23, %c0_24, %c0_25, %c0_26], %47 {strides = array<i32>} : memref<1x8x8x128xbf16, #tpu.memory_space<vmem>>, vector<1x8x8x128xbf16>,
    return
  }
  func.func @transform_0(%arg0: i32, %arg1: i32) -> (i32, i32, i32, i32) {
    %c4_i32 = arith.constant 4 : i32
    %0 = arith.muli %arg1, %c4_i32 : i32
    %c1_i32 = arith.constant 1 : i32
    %1 = arith.subi %0, %c1_i32 : i32
    %c0_i32 = arith.constant 0 : i32
    %2 = arith.maxsi %1, %c0_i32 : i32
    %c0_i32_0 = arith.constant 0 : i32
    %c0_i32_1 = arith.constant 0 : i32
    %c0_i32_2 = arith.constant 0 : i32
    return %arg0, %2, %c0_i32_0, %c0_i32_1 : i32, i32, i32, i32
  }
  func.func @transform_1(%arg0: i32, %arg1: i32) -> (i32, i32, i32, i32) {
    %c0_i32 = arith.constant 0 : i32
    %c0_i32_0 = arith.constant 0 : i32
    %c0_i32_1 = arith.constant 0 : i32
    return %arg0, %arg1, %c0_i32, %c0_i32_0 : i32, i32, i32, i32
  }
  func.func @transform_2(%arg0: i32, %arg1: i32) -> (i32, i32, i32, i32) {
    %c4_i32 = arith.constant 4 : i32
    %0 = arith.muli %arg1, %c4_i32 : i32
    %c4_i32_0 = arith.constant 4 : i32
    %1 = arith.addi %0, %c4_i32_0 : i32
    %c7_i32 = arith.constant 7 : i32
    %2 = arith.minsi %1, %c7_i32 : i32
    %c0_i32 = arith.constant 0 : i32
    %c0_i32_1 = arith.constant 0 : i32
    %c0_i32_2 = arith.constant 0 : i32
    return %arg0, %2, %c0_i32, %c0_i32_1 : i32, i32, i32, i32
  }
  func.func @transform_3(%arg0: i32, %arg1: i32) -> (i32, i32, i32) {
    %c0_i32 = arith.constant 0 : i32
    %c0_i32_0 = arith.constant 0 : i32
    %c0_i32_1 = arith.constant 0 : i32
    %c0_i32_2 = arith.constant 0 : i32
    return %c0_i32, %c0_i32_0, %c0_i32_1 : i32, i32, i32
  }
  func.func @transform_4(%arg0: i32, %arg1: i32) -> (i32, i32) {
    %c0_i32 = arith.constant 0 : i32
    %c0_i32_0 = arith.constant 0 : i32
    %c0_i32_1 = arith.constant 0 : i32
    return %c0_i32, %c0_i32_0 : i32, i32
  }
  func.func @transform_5(%arg0: i32, %arg1: i32) -> (i32, i32, i32, i32) {
    %c0_i32 = arith.constant 0 : i32
    %c0_i32_0 = arith.constant 0 : i32
    %c0_i32_1 = arith.constant 0 : i32
    return %arg0, %arg1, %c0_i32, %c0_i32_0 : i32, i32, i32, i32
  }
}

module attributes {stable_mosaic.version = 11 : i64} {
  func.func @_conv_band_kernel(%arg0: i32, %arg1: i32, %arg2: memref<1x1x16x64xbf16, #tpu.memory_space<vmem>>, %arg3: memref<1x8x16x64xbf16, #tpu.memory_space<vmem>>, %arg4: memref<1x1x16x64xbf16, #tpu.memory_space<vmem>>, %arg5: memref<3x192x3xbf16, #tpu.memory_space<vmem>>, %arg6: memref<1x3xf32, #tpu.memory_space<vmem>>, %arg7: memref<1x8x16x3xf32, #tpu.memory_space<vmem>>) attributes {dimension_semantics = [#tpu.dimension_semantics<parallel>, #tpu.dimension_semantics<parallel>], iteration_bounds = array<i64: 2, 2>, scalar_prefetch = 0 : i64, scratch_operands = 0 : i64, tpu.core_type = #tpu.core_type<tc>, window_params = [{transform_indices = @transform_0, window_bounds = array<i64: 1, 1, 16, 64>}, {transform_indices = @transform_1, window_bounds = array<i64: 1, 8, 16, 64>}, {transform_indices = @transform_2, window_bounds = array<i64: 1, 1, 16, 64>}, {pipeline_mode = #tpu.pipeline_mode<synchronous>, transform_indices = @transform_3, window_bounds = array<i64: 3, 192, 3>}, {pipeline_mode = #tpu.pipeline_mode<synchronous>, transform_indices = @transform_4, window_bounds = array<i64: 1, 3>}, {transform_indices = @transform_5, window_bounds = array<i64: 1, 8, 16, 3>}]} {
    %c0 = arith.constant 0 : index
    %c0_0 = arith.constant 0 : index
    %c0_1 = arith.constant 0 : index
    %c0_2 = arith.constant 0 : index
    %0 = vector.load %arg2[%c0, %c0_0, %c0_1, %c0_2] : memref<1x1x16x64xbf16, #tpu.memory_space<vmem>>, vector<1x1x16x64xbf16>
    %1 = vector.shape_cast %0 : vector<1x1x16x64xbf16> to vector<1x16x64xbf16>
    %c0_3 = arith.constant 0 : index
    %c0_4 = arith.constant 0 : index
    %c0_5 = arith.constant 0 : index
    %c0_6 = arith.constant 0 : index
    %2 = vector.load %arg3[%c0_3, %c0_4, %c0_5, %c0_6] : memref<1x8x16x64xbf16, #tpu.memory_space<vmem>>, vector<1x8x16x64xbf16>
    %3 = vector.shape_cast %2 : vector<1x8x16x64xbf16> to vector<8x16x64xbf16>
    %c0_7 = arith.constant 0 : index
    %c0_8 = arith.constant 0 : index
    %c0_9 = arith.constant 0 : index
    %c0_10 = arith.constant 0 : index
    %4 = vector.load %arg4[%c0_7, %c0_8, %c0_9, %c0_10] : memref<1x1x16x64xbf16, #tpu.memory_space<vmem>>, vector<1x1x16x64xbf16>
    %5 = vector.shape_cast %4 : vector<1x1x16x64xbf16> to vector<1x16x64xbf16>
    %6 = tpu.concatenate %1, %3, %5 in 0 : vector<1x16x64xbf16>, vector<8x16x64xbf16>, vector<1x16x64xbf16> -> vector<10x16x64xbf16>
    %7 = vector.extract_strided_slice %6 {offsets = [0, 1, 0], sizes = [10, 1, 64], strides = [1, 1, 1]} : vector<10x16x64xbf16> to vector<10x1x64xbf16>
    %8 = vector.extract_strided_slice %6 {offsets = [0, 0, 0], sizes = [10, 15, 64], strides = [1, 1, 1]} : vector<10x16x64xbf16> to vector<10x15x64xbf16>
    %9 = tpu.concatenate %7, %8 in 1 : vector<10x1x64xbf16>, vector<10x15x64xbf16> -> vector<10x16x64xbf16>
    %10 = vector.extract_strided_slice %6 {offsets = [0, 1, 0], sizes = [10, 15, 64], strides = [1, 1, 1]} : vector<10x16x64xbf16> to vector<10x15x64xbf16>
    %11 = vector.extract_strided_slice %6 {offsets = [0, 14, 0], sizes = [10, 1, 64], strides = [1, 1, 1]} : vector<10x16x64xbf16> to vector<10x1x64xbf16>
    %12 = tpu.concatenate %10, %11 in 1 : vector<10x15x64xbf16>, vector<10x1x64xbf16> -> vector<10x16x64xbf16>
    %13 = tpu.concatenate %9, %6, %12 in 2 : vector<10x16x64xbf16>, vector<10x16x64xbf16>, vector<10x16x64xbf16> -> vector<10x16x192xbf16>
    %14 = vector.extract_strided_slice %13 {offsets = [0, 0, 0], sizes = [8, 16, 192], strides = [1, 1, 1]} : vector<10x16x192xbf16> to vector<8x16x192xbf16>
    %15 = vector.shape_cast %14 : vector<8x16x192xbf16> to vector<128x192xbf16>
    %c0_11 = arith.constant 0 : index
    %c0_12 = arith.constant 0 : index
    %c0_13 = arith.constant 0 : index
    %16 = vector.load %arg5[%c0_11, %c0_12, %c0_13] : memref<3x192x3xbf16, #tpu.memory_space<vmem>>, vector<1x192x3xbf16>
    %17 = vector.shape_cast %16 : vector<1x192x3xbf16> to vector<192x3xbf16>
    %cst = arith.constant dense<0.000000e+00> : vector<128x3xf32>
    %18 = tpu.matmul %15, %17, %cst {dimension_numbers = #tpu.dot_dimension_numbers<[1], [0], [0], [1], [0, 0, 1, 1], [], []>} : vector<128x192xbf16>, vector<192x3xbf16>, vector<128x3xf32> -> vector<128x3xf32>
    %19 = vector.extract_strided_slice %13 {offsets = [1, 0, 0], sizes = [8, 16, 192], strides = [1, 1, 1]} : vector<10x16x192xbf16> to vector<8x16x192xbf16>
    %20 = vector.shape_cast %19 : vector<8x16x192xbf16> to vector<128x192xbf16>
    %c1 = arith.constant 1 : index
    %c0_14 = arith.constant 0 : index
    %c0_15 = arith.constant 0 : index
    %21 = vector.load %arg5[%c1, %c0_14, %c0_15] : memref<3x192x3xbf16, #tpu.memory_space<vmem>>, vector<1x192x3xbf16>
    %22 = vector.shape_cast %21 : vector<1x192x3xbf16> to vector<192x3xbf16>
    %cst_16 = arith.constant dense<0.000000e+00> : vector<128x3xf32>
    %23 = tpu.matmul %20, %22, %cst_16 {dimension_numbers = #tpu.dot_dimension_numbers<[1], [0], [0], [1], [0, 0, 1, 1], [], []>} : vector<128x192xbf16>, vector<192x3xbf16>, vector<128x3xf32> -> vector<128x3xf32>
    %24 = arith.addf %18, %23 : vector<128x3xf32>
    %25 = vector.extract_strided_slice %13 {offsets = [2, 0, 0], sizes = [8, 16, 192], strides = [1, 1, 1]} : vector<10x16x192xbf16> to vector<8x16x192xbf16>
    %26 = vector.shape_cast %25 : vector<8x16x192xbf16> to vector<128x192xbf16>
    %c2 = arith.constant 2 : index
    %c0_17 = arith.constant 0 : index
    %c0_18 = arith.constant 0 : index
    %27 = vector.load %arg5[%c2, %c0_17, %c0_18] : memref<3x192x3xbf16, #tpu.memory_space<vmem>>, vector<1x192x3xbf16>
    %28 = vector.shape_cast %27 : vector<1x192x3xbf16> to vector<192x3xbf16>
    %cst_19 = arith.constant dense<0.000000e+00> : vector<128x3xf32>
    %29 = tpu.matmul %26, %28, %cst_19 {dimension_numbers = #tpu.dot_dimension_numbers<[1], [0], [0], [1], [0, 0, 1, 1], [], []>} : vector<128x192xbf16>, vector<192x3xbf16>, vector<128x3xf32> -> vector<128x3xf32>
    %30 = arith.addf %24, %29 : vector<128x3xf32>
    %c0_20 = arith.constant 0 : index
    %c0_21 = arith.constant 0 : index
    %31 = vector.load %arg6[%c0_20, %c0_21] : memref<1x3xf32, #tpu.memory_space<vmem>>, vector<1x3xf32>
    %32 = vector.broadcast %31 : vector<1x3xf32> to vector<128x3xf32>
    %33 = arith.addf %30, %32 : vector<128x3xf32>
    %34 = vector.shape_cast %33 : vector<128x3xf32> to vector<8x16x3xf32>
    %c0_22 = arith.constant 0 : index
    %c0_23 = arith.constant 0 : index
    %c0_24 = arith.constant 0 : index
    %c0_25 = arith.constant 0 : index
    %35 = vector.load %arg7[%c0_22, %c0_23, %c0_24, %c0_25] : memref<1x8x16x3xf32, #tpu.memory_space<vmem>>, vector<1x8x16x3xf32>
    %36 = vector.shape_cast %35 : vector<1x8x16x3xf32> to vector<8x16x3xf32>
    %37 = vector.shape_cast %34 : vector<8x16x3xf32> to vector<1x8x16x3xf32>
    tpu.vector_store %arg7[%c0_22, %c0_23, %c0_24, %c0_25], %37 {strides = array<i32>} : memref<1x8x16x3xf32, #tpu.memory_space<vmem>>, vector<1x8x16x3xf32>,
    return
  }
  func.func @transform_0(%arg0: i32, %arg1: i32) -> (i32, i32, i32, i32) {
    %c8_i32 = arith.constant 8 : i32
    %0 = arith.muli %arg1, %c8_i32 : i32
    %c1_i32 = arith.constant 1 : i32
    %1 = arith.subi %0, %c1_i32 : i32
    %2 = math.absi %1 : i32
    %c0_i32 = arith.constant 0 : i32
    %c0_i32_0 = arith.constant 0 : i32
    %c0_i32_1 = arith.constant 0 : i32
    return %arg0, %2, %c0_i32, %c0_i32_0 : i32, i32, i32, i32
  }
  func.func @transform_1(%arg0: i32, %arg1: i32) -> (i32, i32, i32, i32) {
    %c0_i32 = arith.constant 0 : i32
    %c0_i32_0 = arith.constant 0 : i32
    %c0_i32_1 = arith.constant 0 : i32
    return %arg0, %arg1, %c0_i32, %c0_i32_0 : i32, i32, i32, i32
  }
  func.func @transform_2(%arg0: i32, %arg1: i32) -> (i32, i32, i32, i32) {
    %c8_i32 = arith.constant 8 : i32
    %0 = arith.muli %arg1, %c8_i32 : i32
    %c8_i32_0 = arith.constant 8 : i32
    %1 = arith.addi %0, %c8_i32_0 : i32
    %c15_i32 = arith.constant 15 : i32
    %2 = arith.subi %c15_i32, %1 : i32
    %3 = math.absi %2 : i32
    %c15_i32_1 = arith.constant 15 : i32
    %4 = arith.subi %c15_i32_1, %3 : i32
    %c0_i32 = arith.constant 0 : i32
    %c0_i32_2 = arith.constant 0 : i32
    %c0_i32_3 = arith.constant 0 : i32
    return %arg0, %4, %c0_i32, %c0_i32_2 : i32, i32, i32, i32
  }
  func.func @transform_3(%arg0: i32, %arg1: i32) -> (i32, i32, i32) {
    %c0_i32 = arith.constant 0 : i32
    %c0_i32_0 = arith.constant 0 : i32
    %c0_i32_1 = arith.constant 0 : i32
    %c0_i32_2 = arith.constant 0 : i32
    return %c0_i32, %c0_i32_0, %c0_i32_1 : i32, i32, i32
  }
  func.func @transform_4(%arg0: i32, %arg1: i32) -> (i32, i32) {
    %c0_i32 = arith.constant 0 : i32
    %c0_i32_0 = arith.constant 0 : i32
    %c0_i32_1 = arith.constant 0 : i32
    return %c0_i32, %c0_i32_0 : i32, i32
  }
  func.func @transform_5(%arg0: i32, %arg1: i32) -> (i32, i32, i32, i32) {
    %c0_i32 = arith.constant 0 : i32
    %c0_i32_0 = arith.constant 0 : i32
    %c0_i32_1 = arith.constant 0 : i32
    return %arg0, %arg1, %c0_i32, %c0_i32_0 : i32, i32, i32, i32
  }
}

</mosaic_0001>

<bundles_post_ra>
// kernel: decoder2_forward.4
= control target key start
LH: loop header
LB: loop body
LE: loop exit
PB: predicated region body
PF: predicated region fallthrough
CT: control target
= control target key end

     0   :  { %s1870_s18 = smov 0   ;;  %s1872_s19 = smov 0   ;;  %s2258_s0 = inlined_call_operand.vmem [shape: bf16[2,8,8,64], index: 0, kind: input, shape index: {}, may-alias: {0,1,2}]   ;;  %s2259_s1 = inlined_call_operand.vmem [shape: bf16[2,8,8,64], index: 1, kind: input, shape index: {}, may-alias: {0,1,2}]   ;;  %s2260_s2 = inlined_call_operand.vmem [shape: bf16[2,8,8,64], index: 2, kind: input, shape index: {}, may-alias: {0,1,2}]   ;;  %s2261_s3 = inlined_call_operand.vmem [shape: bf16[3,256,128], index: 3, kind: input, shape index: {}]   ;;  %s2262_s4 = inlined_call_operand.vmem [shape: f32[1,128], index: 4, kind: input, shape index: {}]   ;;  %s2263_s5 = inlined_call_operand.vmem [shape: bf16[2,16,8,128], index: 5, kind: output, shape index: {}]  }
   0x1   :  { %s1874_s20 = smov 0   ;;  %s1876_s21 = smov 0  }
   0x2   :  { %s1878_s22 = smov 0  }
   0x3 LB: > { %s24_s23 = sadd.s32 1, %s1829_s20  ;;  %s27_s24 = sadd.s32 1, %s1833_s21  ;;  %s1837_s22 = sphi %s1878_s22, %s15_s22   ;;  %s1833_s21 = sphi %s1876_s21, %s2272_s21   ;;  %s1829_s20 = sphi %s1874_s20, %s2271_s20   ;;  %s1825_s19 = sphi %s1872_s19, %s2270_s19   ;;  %s1821_s18 = sphi %s1870_s18, %s2269_s18  }
   0x4   : > { %p25_p0 = scmp.ge.s32.totalorder %s24_s23, 2  ;;  %p1382_p1 = scmp.ge.s32.totalorder %s1837_s22, 1 }
   0x5   : > { %p270_p2 = scmp.lt.s32.totalorder %s1837_s22, 5 }
   0x6   : > { %s2274_s23 = smov (%p25_p0, %s24_s23), 0  ;;  %s2276_s24 = smov (!%p25_p0, %s27_s24), %s1833_s21 }
   0x7   : > { %p271_p3 = pnand %p1382_p1, %p270_p2  ;;  %p29_p4 = scmp.ge.s32.totalorder %s2276_s24, 2 }
   0x8   : > { %s1903_s25 = sshll.u32 (!%p271_p3), %s1821_s18, 2  ;;  %p334_p5 = scmp.lt.s32.totalorder (!%p271_p3), %s1825_s19, 1 }
   0x9   : > { %s2278_s24 = smov (%p29_p4, %s2276_s24), 0  ;;  %274 = sbr.rel (%p271_p3) target bundleno = 403 (0x193), region = 40 }
   0xa   : > { %s1384_s28 = sadd.s32 (!%p271_p3), 4294967295, %s1903_s25  ;;  %p349_p8 = scmp.lt.s32.totalorder (!%p271_p3), %s1903_s25, 7 }
   0xb   : > { %p332_p6 = scmp.gt.s32.totalorder (!%p271_p3), %s1384_s28, 0  ;;  %p1385_p7 = scmp.lt.s32.totalorder (!%p271_p3), %s1384_s28, 7 }
   0xc   : > { %s357_s27 = sadd.s32 (!%p271_p3), 4, %s1903_s25  ;;  %s1839_s9 = smov (!%p271_p3), 64  }
   0xd   : > { %p1954_p9 = scmp.lt.s32.totalorder (!%p271_p3), %s357_s27, 7 }
   0xe   : > { %v1751_v0 = vld [vmem:[%s2261_s3 + $0xf8] sm:$0xff]   ;;  %s2280_s19 = smov (!%p334_p5, %s1825_s19), 1  ;;  %s2282_s28 = smov (!%p332_p6, %s1384_s28), 0  ;;  %v1755_v4 = vld [vmem:[%s2261_s3 + $0xf0] sm:$0xff]   ;;  %vm482_vm0 = vcmask 1043456   ;;  %v1759_v8 = vld [vmem:[%s2261_s3 + $0xe8] sm:$0xff]  }
   0xf   : > { %1568 = vmatprep.subr.bf16.mxu0 %v1751_v0  ;;  %v1752_v1 = vld [vmem:[%s2261_s3 + $0x78] sm:$0xff]   ;;  %s1918_s8 = sshll.u32 %s2280_s19, 3  ;;  %s2284_s28 = smov (!%p1385_p7, %s2282_s28), 7  ;;  %vm483_vm1 = vsmask.f32 3328  ;;  %v1756_v5 = vld [vmem:[%s2261_s3 + $0x70] sm:$0xff]  }
  0x10   : > { %v1753_v2 = vld [vmem:[%s2261_s3 + $0xb8] sm:$0xff]   ;;  %1608 = vmatprep.subr.bf16.mxu1 %v1752_v1  ;;  %s350_s15 = scalar_select %p349_p8, %s1903_s25, 7  ;;  %v1757_v6 = vld [vmem:[%s2261_s3 + $0xb0] sm:$0xff]   ;;  %v1760_v9 = vld [vmem:[%s2261_s3 + $0x68] sm:$0xff]   ;;  %vm455_vm3 = vcmask 1040384   ;;  %vm521_vm6 = vcmask 523264  }
  0x11   : > { %v1754_v3 = vld [vmem:[%s2261_s3 + $0x38] sm:$0xff]   ;;  %1569 = vmatpush3.bf16.msra.mxu0 %v1753_v2  ;;  %s339_s26 = sadd.s32 %s2284_s28, %s1918_s8  ;;  %v1758_v7 = vld [vmem:[%s2261_s3 + $0x30] sm:$0xff]   ;;  %v1761_v11 = vld [vmem:[%s2261_s3 + $0xa8] sm:$0xff]   ;;  %s2286_s27 = smov (!%p1954_p9, %s357_s27), 7  ;;  %vm456_vm4 = vsmask.f32 256 }
  0x12   : > { %1609 = vmatpush3.bf16.msra.mxu1 %v1754_v3  ;;  %1570 = vmatprep.subr.bf16.mxu0 %v1755_v4  ;;  %s1391_s6 = sshll.u32 %s339_s26, 2  ;;  %s352_s7 = sadd.s32 %s1918_s8, %s350_s15  ;;  %v1762_v20 = vld [vmem:[%s2261_s3 + $0x28] sm:$0xff]   ;;  %v1763_v27 = vld [vmem:[%s2261_s3 + $0xe0] sm:$0xff]   ;;  %vm1994_vm2 = vmand %vm482_vm0, %vm483_vm1 }
  0x13   : > { %1610 = vmatprep.subr.bf16.mxu1 %v1756_v5  ;;  %s341_s13 = scalar_lea.vmem %s2258_s0, %s1391_s6  ;;  %s1394_s14 = sshll.u32 %s352_s7, 2  ;;  %v1764_v42 = vld [vmem:[%s2261_s3 + $0x60] sm:$0xff]   ;;  %v1767_v57 = vld [vmem:[%s2261_s3 + $0xd8] sm:$0xff]   ;;  %v1771_v1 = vld [vmem:[%s2261_s3 + $0xd0] sm:$0xff]  }
  0x14   : > { %v1949_v10 = vld [vmem:[%s341_s13] sm:$0xf]  ;;  %s354_s15 = scalar_lea.vmem %s2259_s1, %s1394_s14  ;;  %s2288_s27 = smov (!%p1954_p9, %s2286_s27), 7  ;;  %v1768_v58 = vld [vmem:[%s2261_s3 + $0x58] sm:$0xff]   ;;  %v1772_v3 = vld [vmem:[%s2261_s3 + $0x50] sm:$0xff]  }
  0x15   : > { %1571 = vmatpush3.bf16.msra.mxu0 %v1757_v6  ;;  %v1404_v12 = vcombine.low %v1949_v10, %v1949_v10  ;;  %v1963_v13 = vld [vmem:[%s354_s15] sm:$0xf]  ;;  %v1965_v14 = vld [vmem:[%s354_s15 + $0x4] sm:$0xf]  ;;  %v1967_v15 = vld [vmem:[%s354_s15 + $0x8] sm:$0xf]  ;;  %s365_s12 = sadd.s32 %s1918_s8, %s2288_s27 }
  0x16   : > { %1611 = vmatpush3.bf16.msra.mxu1 %v1758_v7  ;;  %1572 = vmatprep.subr.bf16.mxu0 %v1759_v8  ;;  %v1405_v16 = vcombine.low %v1963_v13, %v1963_v13  ;;  %v1406_v17 = vcombine.low %v1965_v14, %v1965_v14  ;;  %v1975_v18 = vcombine.low %v1967_v15, %v1967_v15  ;;  %v1977_v19 = vld [vmem:[%s354_s15 + $0xc] sm:$0xf]  ;;  %s1400_s13 = sshll.u32 %s365_s12, 2  ;;  %v1765_v47 = vld [vmem:[%s2261_s3 + $0xa0] sm:$0xff]   ;;  %v1769_v61 = vld [vmem:[%s2261_s3 + $0x98] sm:$0xff]   ;;  %s1401_s25 = sshll.u32 %s1821_s18, 3 }
  0x17   : > { %1612 = vmatprep.subr.bf16.mxu1 %v1760_v9  ;;  %491 = vrot.lane.b32.xlu1 %v1404_v12, %s1839_s9  ;;  %v411_v21 = vshll.u32 %v1404_v12, 16  ;;  %v408_v22 = vshrl.u32 %v1404_v12, 16  ;;  %v1408_v36 = vcombine.low %v1977_v19, %v1977_v19  ;;  %s367_s28 = scalar_lea.vmem %s2260_s2, %s1400_s13  ;;  %v1766_v52 = vld [vmem:[%s2261_s3 + $0x20] sm:$0xff]   ;;  %v1770_v62 = vld [vmem:[%s2261_s3 + $0x18] sm:$0xff]   ;;  %v1773_v5 = vld [vmem:[%s2261_s3 + $0x90] sm:$0xff]   ;;  %p375_p10 = scmp.lt.s32.totalorder %s1401_s25, 15 }
  0x18   : > { %v418_v23 = vshll.u32 %v1405_v16, 16  ;;  %v415_v24 = vshrl.u32 %v1405_v16, 16  ;;  %v425_v25 = vshll.u32 %v1406_v17, 16  ;;  %v422_v26 = vshrl.u32 %v1406_v17, 16  ;;  %v2013_v46 = vld [vmem:[%s367_s28] sm:$0xf]  ;;  %vm2110_vm5 = vmand %vm455_vm3, %vm456_vm4 }
  0x19   : > { %1573 = vmatpush3.bf16.msra.mxu0 %v1761_v11  ;;  %v464_v28 = vrot.slane %v411_v21, 1  ;;  %v410_v29 = vrot.slane %v408_v22, 7  ;;  %v429_v30 = vshrl.u32 %v1975_v18, 16  ;;  %v432_v31 = vshll.u32 %v1975_v18, 16  ;;  %v1774_v9 = vld [vmem:[%s2261_s3 + $0x10] sm:$0xff]   ;;  %v1775_v11 = vld [vmem:[%s2261_s3 + $0xc8] sm:$0xff]  }
  0x1a   : > { %1613 = vmatpush3.bf16.msra.mxu1 %v1762_v20  ;;  %v417_v33 = vrot.slane %v415_v24, 7  ;;  %v466_v34 = vrot.slane %v418_v23, 1  ;;  %v468_v35 = vrot.slane %v425_v25, 1  ;;  %1574 = vmatprep.subr.bf16.mxu0 %v1763_v27  ;;  %v424_v38 = vrot.slane %v422_v26, 7  ;;  %v1782_v27 = vld [vmem:[%s2261_s3] sm:$0xff]   ;;  %s2290_s25 = smov (!%p375_p10, %s1401_s25), 15 }
  0x1b   : > { %v465_v37 = vor.u32 %v464_v28, %v408_v22  ;;  %493 = vrot.lane.b32.xlu1 %v1405_v16, %s1839_s9  ;;  %v431_v39 = vrot.slane %v429_v30, 7  ;;  %v470_v41 = vrot.slane %v432_v31, 1  ;;  %v2008_v43 = vor.u32 %v411_v21, %v410_v29  ;;  %1614 = vmatprep.subr.bf16.mxu1 %v1764_v42  ;;  %v1776_v16 = vld [vmem:[%s2261_s3 + $0x48] sm:$0xff]   ;;  %v1779_v22 = vld [vmem:[%s2261_s3 + $0xc0] sm:$0xff]   ;;  %v1783_v28 = vld [vmem:[%s2261_s3 + $0x178] sm:$0xff]   ;;  %s1402_s18 = sshll.u32 %s2280_s19, 4 }
  0x1c   : > { %v467_v40 = vor.u32 %v466_v34, %v415_v24  ;;  %v436_v45 = vshrl.u32 %v1408_v36, 16  ;;  %v2018_v48 = vor.u32 %v418_v23, %v417_v33  ;;  %v469_v49 = vor.u32 %v468_v35, %v422_v26  ;;  %v1778_v21 = vld [vmem:[%s2261_s3 + $0x8] sm:$0xff]   ;;  %v1780_v24 = vld [vmem:[%s2261_s3 + $0x40] sm:$0xff]   ;;  %s378_s27 = sadd.s32 %s1402_s18, %s2290_s25 }
  0x1d   : > { %v485_v44 = vsel %vm1994_vm2, %v465_v37, %v1949_v10  ;;  %v439_v50 = vshll.u32 %v1408_v36, 16  ;;  %v1409_v51 = vcombine.low %v2013_v46, %v2013_v46  ;;  %1575 = vmatpush3.bf16.msra.mxu0 %v1765_v47  ;;  %v2030_v54 = vor.u32 %v425_v25, %v424_v38  ;;  %v1781_v25 = vld [vmem:[%s2261_s3 + $0x80] sm:$0xff]   ;;  %s1403_s19 = sshll.u32 %s378_s27, 2 }
  0x1e   : > { %509 = vrot.lane.b32.xlu0 %v485_v44, %s1839_s9  ;;  %v486_v53 = vsel %vm1994_vm2, %v467_v40, %v1963_v13  ;;  %v2032_v55 = vor.u32 %v432_v31, %v431_v39  ;;  %v438_v56 = vrot.slane %v436_v45, 7  ;;  %1615 = vmatpush3.bf16.msra.mxu1 %v1766_v52  ;;  %v487_v63 = vsel %vm1994_vm2, %v469_v49, %v1965_v14 }
  0x1f   : > { %495 = vrot.lane.b32.xlu1 %v1406_v17, %s1839_s9  ;;  %v472_v59 = vrot.slane %v439_v50, 1  ;;  %v446_v60 = vshll.u32 %v1409_v51, 16  ;;  %1576 = vmatprep.subr.bf16.mxu0 %v1767_v57  ;;  %v471_v0 = vor.u32 %v470_v41, %v429_v30  ;;  %v443_v4 = vshrl.u32 %v1409_v51, 16  ;;  %v1777_v17 = vld [vmem:[%s2261_s3 + $0x88] sm:$0xff]  }
  0x20   : > { %1616 = vmatprep.subr.bf16.mxu1 %v1768_v58  ;;  %v2055_v2 = vor.u32 %v439_v50, %v438_v56  ;;  %v458_v31 = vsel %vm2110_vm5, %v1949_v10, %v2008_v43  ;;  %v459_v32 = vsel %vm2110_vm5, %v1963_v13, %v2018_v48  ;;  %v461_v41 = vsel %vm2110_vm5, %v1967_v15, %v2032_v55  ;;  %v1786_v58 = vld [vmem:[%s2261_s3 + $0x130] sm:$0xff]  }
  0x21   : > { %1577 = vmatpush3.bf16.msra.mxu0 %v1769_v61  ;;  %v488_v6 = vsel %vm1994_vm2, %v471_v0, %v1967_v15  ;;  %v473_v7 = vor.u32 %v472_v59, %v436_v45  ;;  %v474_v8 = vrot.slane %v446_v60, 1  ;;  %v445_v12 = vrot.slane %v443_v4, 7 }
  0x22   : > { %511 = vrot.lane.b32.xlu0 %v486_v53, %s1839_s9  ;;  %1617 = vmatpush3.bf16.msra.mxu1 %v1770_v62  ;;  %v1785_v53 = vld [vmem:[%s2261_s3 + $0x170] sm:$0xff]  }
  0x23   : > { %497 = vrot.lane.b32.xlu1 %v1975_v18, %s1839_s9  ;;  %1578 = vmatprep.subr.bf16.mxu0 %v1771_v1  ;;  %v489_v18 = vsel %vm1994_vm2, %v473_v7, %v1977_v19  ;;  %v475_v20 = vor.u32 %v474_v8, %v443_v4  ;;  %v2091_v23 = vor.u32 %v446_v60, %v445_v12  ;;  %v1790_v8 = vld [vmem:[%s2261_s3 + $0x120] sm:$0xff]  }
  0x24   : > { %1618 = vmatprep.subr.bf16.mxu1 %v1772_v3  ;;  %v1788_v3 = vld [vmem:[%s2261_s3 + $0x128] sm:$0xff]  }
  0x25   : > { %1579 = vmatpush3.bf16.msra.mxu0 %v1773_v5  ;;  %v490_v26 = vsel %vm1994_vm2, %v475_v20, %v2013_v46  ;;  %v463_v61 = vsel %vm2110_vm5, %v2013_v46, %v2091_v23  ;;  %v1789_v5 = vld [vmem:[%s2261_s3 + $0x160] sm:$0xff]  }
  0x26   : > { %513 = vrot.lane.b32.xlu0 %v487_v63, %s1839_s9  ;;  %1619 = vmatpush3.bf16.msra.mxu1 %v1774_v9 }
  0x27   : > { %499 = vrot.lane.b32.xlu1 %v1408_v36, %s1839_s9  ;;  %1580 = vmatprep.subr.bf16.mxu0 %v1775_v11  ;;  %v460_v36 = vsel %vm2110_vm5, %v1965_v14, %v2030_v54  ;;  %v1791_v11 = vld [vmem:[%s2261_s3 + $0x158] sm:$0xff]  }
  0x28   : > { %1620 = vmatprep.subr.bf16.mxu1 %v1776_v16 }
  0x29   : > { %1581 = vmatpush3.bf16.msra.mxu0 %v1777_v17  ;;  %v1792_v17 = vld [vmem:[%s2261_s3 + $0x118] sm:$0xff]  }
  0x2a   : > { %515 = vrot.lane.b32.xlu0 %v488_v6, %s1839_s9  ;;  %1621 = vmatpush3.bf16.msra.mxu1 %v1778_v21 }
  0x2b   : > { %501 = vrot.lane.b32.xlu1 %v1409_v51, %s1839_s9  ;;  %1582 = vmatprep.subr.bf16.mxu0 %v1779_v22  ;;  %v1784_v51 = vld [vmem:[%s2261_s3 + $0x138] sm:$0xff]   ;;  %v1795_v22 = vld [vmem:[%s2261_s3 + $0x148] sm:$0xff]  }
  0x2c   : > { %1622 = vmatprep.subr.bf16.mxu1 %v1780_v24  ;;  %v1796_v24 = vld [vmem:[%s2261_s3 + $0x108] sm:$0xff]  }
  0x2d   : > { %1583 = vmatpush3.bf16.msra.mxu0 %v1781_v25  ;;  %v1797_v25 = vld [vmem:[%s2261_s3 + $0x140] sm:$0xff]  }
  0x2e   : > { %517 = vrot.lane.b32.xlu0 %v489_v18, %s1839_s9  ;;  %1623 = vmatpush3.bf16.msra.mxu1 %v1782_v27  ;;  %v1793_v18 = vld [vmem:[%s2261_s3 + $0x150] sm:$0xff]   ;;  %v1798_v27 = vld [vmem:[%s2261_s3 + $0x100] sm:$0xff]  }
  0x2f   : > { %1648 = vmatprep.subr.bf16.mxu0 %v1783_v28  ;;  %1688 = vmatprep.subr.bf16.mxu1 %v1783_v28 }
  0x32   : > { %519 = vrot.lane.b32.xlu0 %v490_v26, %s1839_s9  ;;  %s380_s9 = scalar_lea.vmem %s2263_s5, %s1403_s19 }
  0x89   : > { %v492_v30 = vpop.permute.xlu1 %491 }
  0x8a   : > { %v524_v33 = vsel %vm521_vm6, %v458_v31, %v492_v30 }
  0x8d   : > { %v494_v34 = vpop.permute.xlu1 %493 }
  0x8e   : > { %v527_v35 = vsel %vm521_vm6, %v459_v32, %v494_v34 }
  0x8f   : > { %v1466_v37 = vcombine.low %v524_v33, %v527_v35  ;;  %v1442_v47 = vcombine.low %v527_v35, %v527_v35 }
  0x90   : > { %v510_v38 = vpop.permute.xlu0 %509 }
  0x91   : > { %v496_v39 = vpop.permute.xlu1 %495  ;;  %v542_v45 = vsel %vm521_vm6, %v1949_v10, %v510_v38 }
  0x92   : > { %v530_v40 = vsel %vm521_vm6, %v460_v36, %v496_v39 }
  0x93   : > { %v2133_v42 = vcombine.low %v527_v35, %v530_v40  ;;  %v1444_v0 = vcombine.low %v530_v40, %v530_v40 }
  0x94   : > { %v512_v43 = vpop.permute.xlu0 %511 }
  0x95   : > { %v545_v44 = vsel %vm521_vm6, %v1963_v13, %v512_v43  ;;  %v498_v48 = vpop.permute.xlu1 %497  ;;  %v462_v13 = vsel %vm2110_vm5, %v1977_v19, %v2055_v2 }
  0x96   : > { %v1443_v49 = vcombine.low %v545_v44, %v545_v44  ;;  %v1467_v50 = vcombine.low %v542_v45, %v545_v44  ;;  %v533_v52 = vsel %vm521_vm6, %v461_v41, %v498_v48 }
  0x97   : > { %v2150_v10 = vcombine.low %v530_v40, %v533_v52  ;;  %v1446_v12 = vcombine.low %v533_v52, %v533_v52 }
  0x98   : > { %787 = vmatprep.mubr.bf16.mxu0 %v1443_v49  ;;  %964 = vmatprep.mubr.bf16.mxu1 %v1467_v50  ;;  %v514_v54 = vpop.permute.xlu0 %513 }
  0x99   : > { %v548_v55 = vsel %vm521_vm6, %v1965_v14, %v514_v54  ;;  %788 = vmatmul.mubr.bf16.vlgmr.msra.gmra.mxu0 %v1442_v47  ;;  %965 = vmatmul.mubr.bf16.vlgmr.msra.gmra.mxu1 %v1466_v37  ;;  %v500_v56 = vpop.permute.xlu1 %499  ;;  %v1787_v14 = vld [vmem:[%s2261_s3 + $0x168] sm:$0xff]  }
  0x9a   : > { %1649 = vmatpush3.bf16.msra.mxu0 %v1784_v51  ;;  %1696 = vmatpush3.bf16.msra.mxu1 %v1784_v51  ;;  %v2154_v57 = vcombine.low %v545_v44, %v548_v55  ;;  %v1445_v59 = vcombine.low %v548_v55, %v548_v55  ;;  %v2160_v60 = vsel %vm521_vm6, %v462_v13, %v500_v56 }
  0x9b   : > { %1650 = vmatprep.subr.bf16.mxu0 %v1785_v53  ;;  %1689 = vmatprep.subr.bf16.mxu1 %v1785_v53  ;;  %v2170_v62 = vcombine.low %v533_v52, %v2160_v60  ;;  %v1448_v23 = vcombine.low %v2160_v60, %v2160_v60 }
  0x9c   : > { %v516_v63 = vpop.permute.xlu0 %515  ;;  %972 = vmatprep.mubr.bf16.mxu1 %v2154_v57  ;;  %795 = vmatprep.mubr.bf16.mxu0 %v1445_v59 }
  0x9d   : > { %v502_v1 = vpop.permute.xlu1 %501  ;;  %v551_v2 = vsel %vm521_vm6, %v1967_v15, %v516_v63 }
  0x9e   : > { %1651 = vmatpush3.bf16.msra.mxu0 %v1786_v58  ;;  %1697 = vmatpush3.bf16.msra.mxu1 %v1786_v58  ;;  %v2179_v4 = vsel %vm521_vm6, %v463_v61, %v502_v1  ;;  %v1447_v7 = vcombine.low %v551_v2, %v551_v2  ;;  %v1471_v15 = vcombine.low %v548_v55, %v551_v2 }
  0x9f   : > { %1652 = vmatprep.subr.bf16.mxu0 %v1787_v14  ;;  %1690 = vmatprep.subr.bf16.mxu1 %v1787_v14  ;;  %v1522_v6 = vcombine.low %v2160_v60, %v2179_v4 }
  0xa0   : > { %v518_v9 = vpop.permute.xlu0 %517 }
  0xa1   : > { %796 = vmatmul.mubr.bf16.gmra.mxu0 %v1444_v0  ;;  %973 = vmatmul.mubr.bf16.gmra.mxu1 %v2133_v42  ;;  %v554_v16 = vsel %vm521_vm6, %v1977_v19, %v518_v9  ;;  %v1794_v19 = vld [vmem:[%s2261_s3 + $0x110] sm:$0xff]  }
  0xa2   : > { %1653 = vmatpush3.bf16.msra.mxu0 %v1788_v3  ;;  %1698 = vmatpush3.bf16.msra.mxu1 %v1788_v3  ;;  %v1449_v20 = vcombine.low %v554_v16, %v554_v16  ;;  %v1473_v21 = vcombine.low %v551_v2, %v554_v16 }
  0xa3   : > { %980 = vmatprep.mubr.bf16.mxu1 %v1471_v15  ;;  %1654 = vmatprep.subr.bf16.mxu0 %v1789_v5 }
  0xa4   : > { %1691 = vmatprep.subr.bf16.mxu1 %v1789_v5  ;;  %803 = vmatprep.mubr.bf16.mxu0 %v1447_v7  ;;  %v520_v26 = vpop.permute.xlu0 %519 }
  0xa5   : > { %v557_v28 = vsel %vm521_vm6, %v2013_v46, %v520_v26 }
  0xa6   : > { %1655 = vmatpush3.bf16.msra.mxu0 %v1790_v8  ;;  %1699 = vmatpush3.bf16.msra.mxu1 %v1790_v8  ;;  %v1523_v29 = vcombine.low %v554_v16, %v557_v28 }
  0xa7   : > { %1656 = vmatprep.subr.bf16.mxu0 %v1791_v11  ;;  %1692 = vmatprep.subr.bf16.mxu1 %v1791_v11 }
  0xa9   : > { %804 = vmatmul.mubr.bf16.gmra.mxu0 %v1446_v12  ;;  %981 = vmatmul.mubr.bf16.gmra.mxu1 %v2150_v10 }
  0xaa   : > { %1657 = vmatpush3.bf16.msra.mxu0 %v1792_v17  ;;  %1700 = vmatpush3.bf16.msra.mxu1 %v1792_v17 }
  0xab   : > { %988 = vmatprep.mubr.bf16.mxu1 %v1473_v21  ;;  %1658 = vmatprep.subr.bf16.mxu0 %v1793_v18 }
  0xac   : > { %1693 = vmatprep.subr.bf16.mxu1 %v1793_v18  ;;  %811 = vmatprep.mubr.bf16.mxu0 %v1449_v20 }
  0xae   : > { %1659 = vmatpush3.bf16.msra.mxu0 %v1794_v19  ;;  %1701 = vmatpush3.bf16.msra.mxu1 %v1794_v19 }
  0xaf   : > { %1660 = vmatprep.subr.bf16.mxu0 %v1795_v22  ;;  %1694 = vmatprep.subr.bf16.mxu1 %v1795_v22 }
  0xb1   : > { %812 = vmatmul.mubr.bf16.gmra.mxu0 %v1448_v23  ;;  %989 = vmatmul.mubr.bf16.gmra.mxu1 %v2170_v62 }
  0xb2   : > { %1661 = vmatpush3.bf16.msra.mxu0 %v1796_v24  ;;  %1702 = vmatpush3.bf16.msra.mxu1 %v1796_v24 }
  0xb3   : > { %1166 = vmatprep.mubr.bf16.mxu0 %v2154_v57  ;;  %1182 = vmatprep.mubr.bf16.mxu1 %v1473_v21  ;;  %v1540_v21 = vld [vmem:[%s2262_s4] ss:$0 sm:$0xff] }
  0xb4   : > { %1662 = vmatprep.subr.bf16.mxu0 %v1797_v25  ;;  %1695 = vmatprep.subr.bf16.mxu1 %v1797_v25 }
  0xb6   : > { %1663 = vmatpush3.bf16.msra.mxu0 %v1798_v27  ;;  %1703 = vmatpush3.bf16.msra.mxu1 %v1798_v27 }
  0xb9   : > { %1167 = vmatmul.mubr.bf16.vlgmr.msra.gmra.mxu0 %v2133_v42  ;;  %1183 = vmatmul.mubr.bf16.vlgmr.msra.gmra.mxu1 %v2170_v62 }
  0xba   : > { %1174 = vmatprep.mubr.bf16.mxu0 %v1471_v15  ;;  %1190 = vmatprep.mubr.bf16.mxu1 %v1523_v29 }
  0xc1   : > { %1175 = vmatmul.mubr.bf16.gmra.mxu0 %v2150_v10  ;;  %1191 = vmatmul.mubr.bf16.gmra.mxu1 %v1522_v6 }
 0x159   : > { %v1584_v30 = vpop.f32.mrf.mxu0  ;;  %v1624_v31 = vpop.f32.mrf.mxu1 }
 0x15b   : > { %v1585_v32 = vpop.f32.mrf.mxu0  ;;  %v1625_v33 = vpop.f32.mrf.mxu1 }
 0x15c   : > { %v1586_v58 = vadd.f32 %v1585_v32, %v1584_v30  ;;  %v1626_v59 = vadd.f32 %v1625_v33, %v1624_v31 }
 0x15d   : > { %v1587_v34 = vpop.f32.mrf.mxu0  ;;  %v1627_v35 = vpop.f32.mrf.mxu1 }
 0x15e   : > { %v967_v1 = vadd.f32 %v1626_v59, %v1586_v58 }
 0x15f   : > { %v1588_v36 = vpop.f32.mrf.mxu0  ;;  %v1628_v46 = vpop.f32.mrf.mxu1 }
 0x160   : > { %v1589_v2 = vadd.f32 %v1588_v36, %v1587_v34  ;;  %v1629_v3 = vadd.f32 %v1628_v46, %v1627_v35 }
 0x161   : > { %v1590_v37 = vpop.f32.mrf.mxu0  ;;  %v1630_v38 = vpop.f32.mrf.mxu1 }
 0x162   : > { %v970_v23 = vadd.f32 %v1629_v3, %v1589_v2 }
 0x163   : > { %v1591_v39 = vpop.f32.mrf.mxu0  ;;  %v1631_v40 = vpop.f32.mrf.mxu1 }
 0x164   : > { %v1592_v18 = vadd.f32 %v1591_v39, %v1590_v37  ;;  %v1632_v20 = vadd.f32 %v1631_v40, %v1630_v38 }
 0x165   : > { %v2226_v41 = vpop.f32.mrf.mxu0  ;;  %v2228_v42 = vpop.f32.mrf.mxu1 }
 0x166   : > { %v975_v35 = vadd.f32 %v1632_v20, %v1592_v18 }
 0x167   : > { %v1594_v43 = vpop.f32.mrf.mxu0  ;;  %v2230_v44 = vpop.f32.mrf.mxu1 }
 0x168   : > { %v1595_v36 = vadd.f32 %v1594_v43, %v2226_v41 }
 0x169   : > { %v1596_v45 = vpop.f32.mrf.mxu0  ;;  %v1636_v47 = vpop.f32.mrf.mxu1 }
 0x16b   : > { %v1597_v48 = vpop.f32.mrf.mxu0  ;;  %v1637_v49 = vpop.f32.mrf.mxu1 }
 0x16c   : > { %v1598_v60 = vadd.f32 %v1597_v48, %v1596_v45  ;;  %v1638_v14 = vadd.f32 %v1637_v49, %v1636_v47  ;;  %v1635_v47 = vadd.f32 %v2230_v44, %v2228_v42 }
 0x16d   : > { %v1599_v50 = vpop.f32.mrf.mxu0  ;;  %v1639_v51 = vpop.f32.mrf.mxu1 }
 0x16e   : > { %v983_v4 = vadd.f32 %v1638_v14, %v1598_v60  ;;  %v978_v42 = vadd.f32 %v1635_v47, %v1595_v36 }
 0x16f   : > { %v1600_v52 = vpop.f32.mrf.mxu0  ;;  %v1640_v53 = vpop.f32.mrf.mxu1 }
 0x170   : > { %v1601_v7 = vadd.f32 %v1600_v52, %v1599_v50  ;;  %v1641_v15 = vadd.f32 %v1640_v53, %v1639_v51 }
 0x171   : > { %v1602_v13 = vpop.f32.mrf.mxu0  ;;  %v1642_v10 = vpop.f32.mrf.mxu1 }
 0x172   : > { %v986_v24 = vadd.f32 %v1641_v15, %v1601_v7 }
 0x173   : > { %v1603_v54 = vpop.f32.mrf.mxu0  ;;  %v1643_v55 = vpop.f32.mrf.mxu1 }
 0x174   : > { %v1604_v27 = vadd.f32 %v1603_v54, %v1602_v13  ;;  %v1644_v28 = vadd.f32 %v1643_v55, %v1642_v10 }
 0x175   : > { %v1605_v56 = vpop.f32.mrf.mxu0  ;;  %v1645_v57 = vpop.f32.mrf.mxu1 }
 0x176   : > { %v991_v48 = vadd.f32 %v1644_v28, %v1604_v27 }
 0x177   : > { %v1606_v61 = vpop.f32.mrf.mxu0  ;;  %v1646_v62 = vpop.f32.mrf.mxu1 }
 0x178   : > { %v1607_v49 = vadd.f32 %v1606_v61, %v1605_v56  ;;  %v1647_v50 = vadd.f32 %v1646_v62, %v1645_v57 }
 0x179   : > { %v1664_v63 = vpop.f32.mrf.mxu0  ;;  %v1676_v0 = vpop.f32.mrf.mxu1 }
 0x17a   : > { %v994_v44 = vadd.f32 %v1647_v50, %v1607_v49 }
 0x17b   : > { %v1665_v5 = vpop.f32.mrf.mxu0  ;;  %v1677_v6 = vpop.f32.mrf.mxu1 }
 0x17c   : > { %v1666_v8 = vadd.f32 %v1665_v5, %v1664_v63  ;;  %v1678_v9 = vadd.f32 %v1677_v6, %v1676_v0 }
 0x17d   : > { %v1667_v11 = vpop.f32.mrf.mxu0  ;;  %v1679_v12 = vpop.f32.mrf.mxu1 }
 0x17e   : > { %v1199_v16 = vadd.f32 %v1666_v8, %v967_v1  ;;  %v1203_v17 = vadd.f32 %v1678_v9, %v983_v4 }
 0x17f   : > { %v1668_v19 = vpop.f32.mrf.mxu0  ;;  %v1680_v22 = vpop.f32.mrf.mxu1 }
 0x180   : > { %v1669_v25 = vadd.f32 %v1668_v19, %v1667_v11  ;;  %v1681_v26 = vadd.f32 %v1680_v22, %v1679_v12  ;;  %v1214_v31 = vadd.f32 %v1540_v21, %v1199_v16  ;;  %v1218_v32 = vadd.f32 %v1540_v21, %v1203_v17 }
 0x181   : > { %v1670_v29 = vpop.f32.mrf.mxu0  ;;  %v1682_v30 = vpop.f32.mrf.mxu1 }
 0x182   : > { %v1200_v33 = vadd.f32 %v1669_v25, %v970_v23  ;;  %v1204_v34 = vadd.f32 %v1681_v26, %v986_v24  ;;  %v1222_v53 = vmax.f32 %v1214_v31, 0.0  ;;  %v1226_v13 = vmax.f32 %v1218_v32, 0.0 }
 0x183   : > { %v1671_v46 = vpop.f32.mrf.mxu0  ;;  %v1683_v37 = vpop.f32.mrf.mxu1 }
 0x184   : > { %v1215_v38 = vadd.f32 %v1540_v21, %v1200_v33  ;;  %v1219_v39 = vadd.f32 %v1540_v21, %v1204_v34  ;;  %v1672_v40 = vadd.f32 %v1671_v46, %v1670_v29  ;;  %v1684_v45 = vadd.f32 %v1683_v37, %v1682_v30 }
 0x185   : > { %v1673_v51 = vpop.f32.mrf.mxu0  ;;  %v1685_v52 = vpop.f32.mrf.mxu1 }
 0x186   : > { %v1223_v10 = vmax.f32 %v1215_v38, 0.0  ;;  %v1227_v54 = vmax.f32 %v1219_v39, 0.0  ;;  %v1201_v41 = vadd.f32 %v1672_v40, %v975_v35  ;;  %v1205_v43 = vadd.f32 %v1684_v45, %v991_v48 }
 0x187   : > { %v1674_v55 = vpop.f32.mrf.mxu0  ;;  %v1686_v58 = vpop.f32.mrf.mxu1 }
 0x188   : > { %v1548_v59 = vpack.c.bf16 %v1223_v10, %v1222_v53  ;;  %v1558_v60 = vpack.c.bf16 %v1227_v54, %v1226_v13  ;;  %v1675_v56 = vadd.f32 %v1674_v55, %v1673_v51  ;;  %v1687_v57 = vadd.f32 %v1686_v58, %v1685_v52 }
 0x189   : > { %v1216_v14 = vadd.f32 %v1540_v21, %v1201_v41  ;;  %v1220_v61 = vadd.f32 %v1540_v21, %v1205_v43 }
 0x18a   : > { %1549 = vst [vmem:[%s380_s9] sm:$0xff] %v1548_v59   ;;  %1566 = vst [vmem:[%s380_s9 + $0x10] sm:$0xff] %v1558_v60   ;;  %v1202_v62 = vadd.f32 %v1675_v56, %v978_v42  ;;  %v1206_v63 = vadd.f32 %v1687_v57, %v994_v44 }
 0x18b   : > { %v1224_v2 = vmax.f32 %v1216_v14, 0.0  ;;  %v1228_v3 = vmax.f32 %v1220_v61, 0.0 }
 0x18c   : > { %v1217_v0 = vadd.f32 %v1540_v21, %v1202_v62  ;;  %v1221_v1 = vadd.f32 %v1540_v21, %v1206_v63 }
 0x18e   : > { %v1225_v4 = vmax.f32 %v1217_v0, 0.0  ;;  %v1229_v5 = vmax.f32 %v1221_v1, 0.0 }
 0x190   : > { %v1553_v6 = vpack.c.bf16 %v1225_v4, %v1224_v2  ;;  %v1563_v7 = vpack.c.bf16 %v1229_v5, %v1228_v3 }
 0x192   : > { %1565 = vst [vmem:[%s380_s9 + $0x8] sm:$0xff] %v1553_v6   ;;  %1567 = vst [vmem:[%s380_s9 + $0x18] sm:$0xff] %v1563_v7  }
 0x193 PF: > { %s15_s22 = sadd.s32 1, %s1837_s22   ;;  %s2269_s18 = smov %s1829_s20 }
 0x194   : > { %p12_p11 = scmp.ge.s32.totalorder %s15_s22, 6   ;;  %s2270_s19 = smov %s1833_s21 }
 0x195   : > { %s2271_s20 = smov %s2274_s23  ;;  %s2272_s21 = smov %s2278_s24 }
 0x196   :  { %14 = sbr.rel (!%p12_p11) target bundleno = 3 (0x3), region = 78 }

// kernel: decoder2_forward.3
= control target key start
LH: loop header
LB: loop body
LE: loop exit
PB: predicated region body
PF: predicated region fallthrough
CT: control target
= control target key end

     0   :  { %s2185_s18 = smov 0   ;;  %s2187_s19 = smov 0   ;;  %s2596_s0 = inlined_call_operand.vmem [shape: bf16[2,8,8,128], index: 0, kind: input, shape index: {}, may-alias: {0,1,2}]   ;;  %s2597_s1 = inlined_call_operand.vmem [shape: bf16[2,8,8,128], index: 1, kind: input, shape index: {}, may-alias: {0,1,2}]   ;;  %s2598_s2 = inlined_call_operand.vmem [shape: bf16[2,8,8,128], index: 2, kind: input, shape index: {}, may-alias: {0,1,2}]   ;;  %s2599_s3 = inlined_call_operand.vmem [shape: bf16[3,384,64], index: 3, kind: input, shape index: {}]   ;;  %s2600_s4 = inlined_call_operand.vmem [shape: f32[1,64], index: 4, kind: input, shape index: {}]   ;;  %s2601_s5 = inlined_call_operand.vmem [shape: bf16[2,8,8,64], index: 5, kind: output, shape index: {}]  }
   0x1   :  { %s2189_s20 = smov 0   ;;  %s2191_s21 = smov 0  }
   0x2   :  { %s2193_s22 = smov 0  }
   0x3 LB: > { %s24_s23 = sadd.s32 1, %s2145_s20  ;;  %s27_s24 = sadd.s32 1, %s2149_s21  ;;  %s2153_s22 = sphi %s2193_s22, %s15_s22   ;;  %s2149_s21 = sphi %s2191_s21, %s2609_s21   ;;  %s2145_s20 = sphi %s2189_s20, %s2608_s20   ;;  %s2141_s19 = sphi %s2187_s19, %s2607_s19   ;;  %s2137_s18 = sphi %s2185_s18, %s2606_s18  }
   0x4   : > { %p25_p0 = scmp.ge.s32.totalorder %s24_s23, 2  ;;  %p1614_p1 = scmp.ge.s32.totalorder %s2153_s22, 1 }
   0x5   : > { %p282_p2 = scmp.lt.s32.totalorder %s2153_s22, 5 }
   0x6   : > { %s2611_s23 = smov (%p25_p0, %s24_s23), 0  ;;  %s2613_s24 = smov (!%p25_p0, %s27_s24), %s2149_s21 }
   0x7   : > { %p283_p3 = pnand %p1614_p1, %p282_p2  ;;  %p29_p4 = scmp.ge.s32.totalorder %s2613_s24, 2 }
   0x8   : > { %s2218_s27 = sshll.u32 (!%p283_p3), %s2137_s18, 2  ;;  %p350_p5 = scmp.lt.s32.totalorder (!%p283_p3), %s2141_s19, 1 }
   0x9   : > { %s2615_s24 = smov (%p29_p4, %s2613_s24), 0  ;;  %286 = sbr.rel (%p283_p3) target bundleno = 331 (0x14b), region = 40 }
   0xa   : > { %p366_p6 = scmp.lt.s32.totalorder (!%p283_p3), %s2218_s27, 7  ;;  %s374_s15 = ssub.s32 (!%p283_p3), 3, %s2218_s27 }
   0xb   : > { %s375_s28 = sshra.s32 (!%p283_p3), %s374_s15, 31  ;;  %s1616_s11 = sadd.s32 (!%p283_p3), 4294967295, %s2218_s27 }
   0xc   : > { %s376_s7 = sadd.s32 (!%p283_p3), %s375_s28, %s374_s15  ;;  %s347_s17 = sshra.s32 (!%p283_p3), %s1616_s11, 31 }
   0xd   : > { %s377_s10 = sxor.u32 (!%p283_p3), %s376_s7, %s375_s28  ;;  %s348_s29 = sadd.s32 (!%p283_p3), %s1616_s11, %s347_s17 }
   0xe   : > { %v2034_v0 = vld [vmem:[%s2599_s3 + $0x138] sm:$0xff]   ;;  %v2037_v3 = vld [vmem:[%s2599_s3 + $0x130] sm:$0xff]   ;;  %s2617_s19 = smov (!%p350_p5, %s2141_s19), 1  ;;  %v2040_v6 = vld [vmem:[%s2599_s3 + $0x128] sm:$0xff]   ;;  %s378_s14 = ssub.s32 7, %s377_s10  ;;  %vm482_vm0 = vcmask 1040384  }
   0xf   : > { %v2035_v1 = vld [vmem:[%s2599_s3 + $0xf8] sm:$0xff]   ;;  %1820 = vmatprep.subr.bf16.mxu0 %v2034_v0  ;;  %v2038_v4 = vld [vmem:[%s2599_s3 + $0xf0] sm:$0xff]   ;;  %v2041_v7 = vld [vmem:[%s2599_s3 + $0xe8] sm:$0xff]   ;;  %s2244_s18 = scalar_select %p366_p6, %s2218_s27, 7  ;;  %vm515_vm1 = vcmask 1043456   ;;  %vm1473_vm6 = vcmask 519168  }
  0x10   : > { %v2036_v2 = vld [vmem:[%s2599_s3 + $0x178] sm:$0xff]   ;;  %1821 = vmatpush3.bf16.msra.mxu0 %v2035_v1  ;;  %v2039_v5 = vld [vmem:[%s2599_s3 + $0x170] sm:$0xff]   ;;  %v2042_v8 = vld [vmem:[%s2599_s3 + $0x168] sm:$0xff]   ;;  %s2252_s6 = sshll.u32 %s2617_s19, 3  ;;  %p381_p7 = scmp.lt.s32.totalorder %s378_s14, 7 }
  0x11   : > { %1934 = vmatprep.subr.bf16.mxu1 %v2036_v2  ;;  %1822 = vmatprep.subr.bf16.mxu0 %v2037_v3  ;;  %v2043_v9 = vld [vmem:[%s2599_s3 + $0x120] sm:$0xff]   ;;  %v2046_v12 = vld [vmem:[%s2599_s3 + $0x118] sm:$0xff]   ;;  %s369_s15 = sadd.s32 %s2252_s6, %s2244_s18  ;;  %v2049_v15 = vld [vmem:[%s2599_s3 + $0x110] sm:$0xff]   ;;  %s349_s18 = sxor.u32 %s348_s29, %s347_s17  ;;  %vm483_vm2 = vsmask.f32 256 }
  0x12   : > { %1935 = vmatpush3.bf16.msra.mxu1 %v2036_v2  ;;  %v2044_v10 = vld [vmem:[%s2599_s3 + $0xe0] sm:$0xff]   ;;  %v2048_v13 = vld [vmem:[%s2599_s3 + $0x158] sm:$0xff]   ;;  %s2619_s14 = smov (!%p381_p7, %s378_s14), 7  ;;  %s2276_s9 = sshll.u32 %s369_s15, 2  ;;  %v2051_v16 = vld [vmem:[%s2599_s3 + $0x150] sm:$0xff]  }
  0x13   : > { %1936 = vmatprep.subr.bf16.mxu1 %v2039_v5  ;;  %v2045_v11 = vld [vmem:[%s2599_s3 + $0x160] sm:$0xff]   ;;  %v2047_v14 = vld [vmem:[%s2599_s3 + $0xd8] sm:$0xff]   ;;  %s384_s8 = sadd.s32 %s2252_s6, %s2619_s14  ;;  %p352_p8 = scmp.lt.s32.totalorder %s349_s18, 7  ;;  %v2050_v17 = vld [vmem:[%s2599_s3 + $0xd0] sm:$0xff]   ;;  %vm516_vm3 = vsmask.f32 3328 }
  0x14   : > { %1823 = vmatpush3.bf16.msra.mxu0 %v2038_v4  ;;  %v2052_v18 = vld [vmem:[%s2599_s3 + $0x108] sm:$0xff]   ;;  %s371_s26 = scalar_lea.vmem %s2597_s1, %s2276_s9  ;;  %s1624_s27 = sshll.u32 %s384_s8, 2  ;;  %v2055_v21 = vld [vmem:[%s2599_s3 + $0x100] sm:$0xff]   ;;  %v2061_v37 = vld [vmem:[%s2599_s3 + $0x78] sm:$0xff]  }
  0x15   : > { %1824 = vmatprep.subr.bf16.mxu0 %v2040_v6  ;;  %s2621_s18 = smov (!%p352_p8, %s349_s18), 7  ;;  %v2053_v19 = vld [vmem:[%s2599_s3 + $0xc8] sm:$0xff]   ;;  %s386_s14 = scalar_lea.vmem %s2598_s2, %s1624_s27  ;;  %v2304_v22 = vld [vmem:[%s371_s26] sm:$0xf]  ;;  %v2306_v23 = vld [vmem:[%s371_s26 + $0x4] sm:$0xf] }
  0x16   : > { %1937 = vmatpush3.bf16.msra.mxu1 %v2039_v5  ;;  %v2054_v20 = vld [vmem:[%s2599_s3 + $0x148] sm:$0xff]   ;;  %s355_s30 = sadd.s32 %s2252_s6, %s2621_s18  ;;  %v2056_v25 = vld [vmem:[%s2599_s3 + $0xc0] sm:$0xff]   ;;  %v1629_v28 = vcombine.low %v2304_v22, %v2304_v22  ;;  %v1630_v29 = vcombine.low %v2306_v23, %v2306_v23  ;;  %v1683_v30 = vcombine.low %v2304_v22, %v2306_v23  ;;  %vm2342_vm4 = vmand %vm482_vm0, %vm483_vm2 }
  0x17   : > { %1938 = vmatprep.subr.bf16.mxu1 %v2042_v8  ;;  %s1618_s12 = sshll.u32 %s355_s30, 2  ;;  %v2308_v24 = vld [vmem:[%s371_s26 + $0x8] sm:$0xf]  ;;  %v2057_v26 = vld [vmem:[%s2599_s3 + $0x140] sm:$0xff]   ;;  %v2316_v27 = vld [vmem:[%s371_s26 + $0xc] sm:$0xf]  ;;  %s401_s30 = scalar_lea.vmem %s2601_s5, %s2276_s9 }
  0x18   : > { %1825 = vmatpush3.bf16.msra.mxu0 %v2041_v7  ;;  %s357_s17 = scalar_lea.vmem %s2596_s0, %s1618_s12  ;;  %v1631_v31 = vcombine.low %v2308_v24, %v2308_v24  ;;  %v2329_v32 = vld [vmem:[%s386_s14] sm:$0xf]  ;;  %v432_v33 = vshrl.u32 %v1629_v28, 16  ;;  %v435_v34 = vshrl.u32 %v1630_v29, 16  ;;  %v457_v35 = vshll.u32 %v1629_v28, 16  ;;  %829 = vmatprep.mubr.bf16.mxu0 %v1683_v30  ;;  %v2351_v50 = vld [vmem:[%s2599_s3 + $0xb8] sm:$0xff]   ;;  %vm2357_vm5 = vmand %vm515_vm1, %vm516_vm3 }
  0x19   : > { %1826 = vmatprep.subr.bf16.mxu0 %v2043_v9  ;;  %v461_v36 = vshll.u32 %v1630_v29, 16  ;;  %v2334_v38 = vld [vmem:[%s357_s17] sm:$0xf]  ;;  %v1632_v40 = vcombine.low %v2316_v27, %v2316_v27  ;;  %v1633_v49 = vcombine.low %v2329_v32, %v2329_v32  ;;  %v1686_v55 = vcombine.low %v2308_v24, %v2316_v27  ;;  %v2064_v0 = vld [vmem:[%s2599_s3 + $0x38] sm:$0xff]   ;;  %v2068_v1 = vld [vmem:[%s2599_s3 + $0x70] sm:$0xff]  }
  0x1a   : > { %1939 = vmatpush3.bf16.msra.mxu1 %v2042_v8  ;;  %v465_v39 = vshll.u32 %v1631_v31, 16  ;;  %v456_v41 = vrot.slane %v432_v33, 7  ;;  %v460_v42 = vrot.slane %v435_v34, 7  ;;  %v1628_v43 = vcombine.low %v2334_v38, %v2334_v38  ;;  %v2070_v30 = vld [vmem:[%s2599_s3 + $0xb0] sm:$0xff]   ;;  %v2084_v54 = vld [vmem:[%s2599_s3 + $0x48] sm:$0xff]  }
  0x1b   : > { %1940 = vmatprep.subr.bf16.mxu1 %v2045_v11  ;;  %v493_v44 = vrot.slane %v457_v35, 1  ;;  %v438_v46 = vshrl.u32 %v1631_v31, 16  ;;  %v495_v47 = vrot.slane %v461_v36, 1  ;;  %v441_v58 = vshrl.u32 %v1632_v40, 16  ;;  %v2093_v45 = vld [vmem:[%s2599_s3 + $0x1f0] sm:$0xff]  }
  0x1c   : > { %1827 = vmatpush3.bf16.msra.mxu0 %v2044_v10  ;;  %v497_v48 = vrot.slane %v465_v39, 1  ;;  %v459_v51 = vor.u32 %v457_v35, %v456_v41  ;;  %v463_v52 = vor.u32 %v461_v36, %v460_v42  ;;  %v2353_v53 = vshll.u32 %v1628_v43, 16 }
  0x1d   : > { %1828 = vmatprep.subr.bf16.mxu0 %v2046_v12  ;;  %v494_v56 = vor.u32 %v493_v44, %v432_v33  ;;  %v496_v57 = vor.u32 %v495_v47, %v435_v34  ;;  %v469_v59 = vshll.u32 %v1632_v40, 16  ;;  %v2371_v62 = vshrl.u32 %v1628_v43, 16  ;;  %v2075_v40 = vld [vmem:[%s2599_s3 + $0x60] sm:$0xff]  }
  0x1e   : > { %1941 = vmatpush3.bf16.msra.mxu1 %v2045_v11  ;;  %v2365_v60 = vsel %vm2342_vm4, %v432_v33, %v459_v51  ;;  %v2369_v61 = vsel %vm2342_vm4, %v435_v34, %v463_v52  ;;  %v491_v63 = vrot.slane %v2353_v53, 1  ;;  %v498_v3 = vor.u32 %v497_v48, %v438_v46  ;;  %v2076_v47 = vld [vmem:[%s2599_s3 + $0x20] sm:$0xff]   ;;  %v2079_v48 = vld [vmem:[%s2599_s3 + $0x18] sm:$0xff]   ;;  %v2082_v52 = vld [vmem:[%s2599_s3 + $0x10] sm:$0xff]  }
  0x1f   : > { %1942 = vmatprep.subr.bf16.mxu1 %v2048_v13  ;;  %v1682_v2 = vcombine.low %v2365_v60, %v2369_v61  ;;  %v519_v4 = vsel %vm2357_vm5, %v494_v56, %v457_v35  ;;  %v2386_v5 = vsel %vm2357_vm5, %v496_v57, %v461_v36  ;;  %v444_v8 = vshrl.u32 %v1633_v49, 16  ;;  %v2073_v35 = vld [vmem:[%s2599_s3 + $0x28] sm:$0xff]  }
  0x20   : > { %1829 = vmatpush3.bf16.msra.mxu0 %v2047_v14  ;;  %v492_v6 = vor.u32 %v491_v63, %v2371_v62  ;;  %v1684_v7 = vcombine.low %v519_v4, %v2386_v5  ;;  %v473_v9 = vshll.u32 %v1633_v49, 16  ;;  %v499_v10 = vrot.slane %v469_v59, 1  ;;  %v2081_v49 = vld [vmem:[%s2599_s3 + $0x50] sm:$0xff]   ;;  %v2085_v57 = vld [vmem:[%s2599_s3 + $0x8] sm:$0xff]  }
  0x21   : > { %1830 = vmatprep.subr.bf16.mxu0 %v2049_v15  ;;  %v464_v11 = vrot.slane %v438_v46, 7  ;;  %v468_v12 = vrot.slane %v441_v58, 7  ;;  %v472_v14 = vrot.slane %v444_v8, 7  ;;  %v2396_v15 = vsel %vm2357_vm5, %v498_v3, %v465_v39  ;;  %v2091_v3 = vld [vmem:[%s2599_s3 + $0x1b8] sm:$0xff]  }
  0x22   : > { %1943 = vmatpush3.bf16.msra.mxu1 %v2048_v13  ;;  %1950 = vmatprep.mubr.bf16.mxu1 %v1684_v7  ;;  %v2069_v13 = vld [vmem:[%s2599_s3 + $0x30] sm:$0xff]   ;;  %v1713_v41 = vcombine.low %v2334_v38, %v2304_v22  ;;  %v2078_v22 = vld [vmem:[%s2599_s3 + $0x58] sm:$0xff]   ;;  %v2077_v38 = vld [vmem:[%s2599_s3 + $0xa0] sm:$0xff]   ;;  %v452_v51 = vrot.slane %v2371_v62, 7 }
  0x23   : > { %1944 = vmatprep.subr.bf16.mxu1 %v2051_v16 }
  0x24   : > { %1831 = vmatpush3.bf16.msra.mxu0 %v2050_v17  ;;  %v501_v17 = vrot.slane %v473_v9, 1  ;;  %v455_v56 = vor.u32 %v2353_v53, %v452_v51 }
  0x25   : > { %1832 = vmatprep.subr.bf16.mxu0 %v2052_v18  ;;  %v467_v18 = vor.u32 %v465_v39, %v464_v11  ;;  %v2102_v11 = vld [vmem:[%s2599_s3 + $0x220] sm:$0xff]  }
  0x26   : > { %1945 = vmatpush3.bf16.msra.mxu1 %v2051_v16  ;;  %v500_v16 = vor.u32 %v499_v10, %v441_v58  ;;  %v502_v28 = vor.u32 %v501_v17, %v444_v8  ;;  %v485_v63 = vsel %vm2342_vm4, %v2371_v62, %v455_v56  ;;  %v1716_v62 = vcombine.low %v2306_v23, %v2308_v24  ;;  %v2095_v24 = vld [vmem:[%s2599_s3 + $0x230] sm:$0xff]   ;;  %v2103_v10 = vld [vmem:[%s2599_s3 + $0x1d8] sm:$0xff]  }
  0x27   : > { %1946 = vmatprep.subr.bf16.mxu1 %v2054_v20  ;;  %v2413_v31 = vsel %vm2342_vm4, %v438_v46, %v467_v18  ;;  %v2074_v46 = vld [vmem:[%s2599_s3 + $0xa8] sm:$0xff]   ;;  %v1717_v23 = vcombine.low %v2386_v5, %v2396_v15  ;;  %v2101_v5 = vld [vmem:[%s2599_s3 + $0x1a0] sm:$0xff]   ;;  %v2108_v17 = vld [vmem:[%s2599_s3 + $0x210] sm:$0xff]  }
  0x28   : > { %1833 = vmatpush3.bf16.msra.mxu0 %v2053_v19  ;;  %v2072_v19 = vld [vmem:[%s2599_s3 + $0x68] sm:$0xff]   ;;  %v522_v29 = vsel %vm2357_vm5, %v500_v16, %v469_v59  ;;  %v1715_v7 = vcombine.low %v2369_v61, %v2413_v31 }
  0x29   : > { %1834 = vmatprep.subr.bf16.mxu0 %v2055_v21  ;;  %v1791_v21 = vcombine.low %v2316_v27, %v2329_v32  ;;  %v1687_v33 = vcombine.low %v2396_v15, %v522_v29  ;;  %v2099_v61 = vld [vmem:[%s2599_s3 + $0x228] sm:$0xff]   ;;  %v2107_v15 = vld [vmem:[%s2599_s3 + $0x190] sm:$0xff]  }
  0x2a   : > { %1947 = vmatpush3.bf16.msra.mxu1 %v2054_v20  ;;  %v471_v20 = vor.u32 %v469_v59, %v468_v12  ;;  %v2086_v59 = vld [vmem:[%s2599_s3 + $0x88] sm:$0xff]   ;;  %v2104_v12 = vld [vmem:[%s2599_s3 + $0x198] sm:$0xff]  }
  0x2b   : > { %1948 = vmatprep.subr.bf16.mxu1 %v2057_v26  ;;  %v2109_v16 = vld [vmem:[%s2599_s3 + $0x1c8] sm:$0xff]  }
  0x2c   : > { %1835 = vmatpush3.bf16.msra.mxu0 %v2056_v25  ;;  %v475_v25 = vor.u32 %v473_v9, %v472_v14  ;;  %v489_v34 = vsel %vm2342_vm4, %v441_v58, %v471_v20  ;;  %v2087_v58 = vld [vmem:[%s2599_s3 + $0x40] sm:$0xff]   ;;  %v2105_v14 = vld [vmem:[%s2599_s3 + $0x218] sm:$0xff]   ;;  %v2110_v18 = vld [vmem:[%s2599_s3 + $0x188] sm:$0xff]  }
  0x2d   : > { %1858 = vmatprep.subr.bf16.mxu0 %v2061_v37  ;;  %v523_v37 = vsel %vm2357_vm5, %v502_v28, %v473_v9  ;;  %v1685_v39 = vcombine.low %v2413_v31, %v489_v34  ;;  %v2100_v9 = vld [vmem:[%s2599_s3 + $0x1e0] sm:$0xff]   ;;  %v2111_v20 = vld [vmem:[%s2599_s3 + $0x208] sm:$0xff]  }
  0x2e   : > { %1949 = vmatpush3.bf16.msra.mxu1 %v2057_v26  ;;  %v518_v26 = vsel %vm2357_vm5, %v492_v6, %v2353_v53  ;;  %v490_v36 = vsel %vm2342_vm4, %v444_v8, %v475_v25  ;;  %v2433_v44 = vcombine.low %v522_v29, %v523_v37  ;;  %v2088_v53 = vld [vmem:[%s2599_s3] sm:$0xff]   ;;  %v2097_v6 = vld [vmem:[%s2599_s3 + $0x1e8] sm:$0xff]  }
  0x2f   : > { %1954 = vmatprep.subr.bf16.mxu1 %v2351_v50  ;;  %830 = vmatmul.mubr.bf16.vlgmr.msra.gmra.mxu0 %v1682_v2  ;;  %v2431_v42 = vcombine.low %v489_v34, %v490_v36  ;;  %v1714_v43 = vcombine.low %v518_v26, %v519_v4  ;;  %v1712_v2 = vcombine.low %v485_v63, %v2365_v60  ;;  %v2092_v60 = vld [vmem:[%s2599_s3 + $0x238] sm:$0xff]   ;;  %v2094_v4 = vld [vmem:[%s2599_s3 + $0x1b0] sm:$0xff]   ;;  %v2098_v8 = vld [vmem:[%s2599_s3 + $0x1a8] sm:$0xff]  }
  0x30   : > { %1859 = vmatpush3.bf16.msra.mxu0 %v2064_v0  ;;  %837 = vmatprep.mubr.bf16.mxu0 %v1686_v55  ;;  %v2083_v55 = vld [vmem:[%s2599_s3 + $0x90] sm:$0xff]   ;;  %v2090_v0 = vld [vmem:[%s2599_s3 + $0x1f8] sm:$0xff]   ;;  %v2113_v25 = vld [vmem:[%s2599_s3 + $0x180] sm:$0xff]  }
  0x31   : > { %1860 = vmatprep.subr.bf16.mxu0 %v2068_v1  ;;  %1951 = vmatmul.mubr.bf16.vlgmr.msra.gmra.mxu1 %v1687_v33  ;;  %v2089_v1 = vld [vmem:[%s2599_s3 + $0x80] sm:$0xff]  }
  0x32   : > { %1955 = vmatpush3.bf16.msra.mxu1 %v2351_v50  ;;  %1970 = vmatprep.mubr.bf16.mxu1 %v1714_v43  ;;  %v2080_v50 = vld [vmem:[%s2599_s3 + $0x98] sm:$0xff]   ;;  %v2114_v26 = vld [vmem:[%s2599_s3 + $0x200] sm:$0xff]  }
  0x33   : > { %1956 = vmatprep.subr.bf16.mxu1 %v2070_v30 }
  0x34   : > { %1861 = vmatpush3.bf16.msra.mxu0 %v2069_v13  ;;  %v2106_v13 = vld [vmem:[%s2599_s3 + $0x1d0] sm:$0xff]  }
  0x35   : > { %1862 = vmatprep.subr.bf16.mxu0 %v2072_v19  ;;  %v2112_v19 = vld [vmem:[%s2599_s3 + $0x1c0] sm:$0xff]  }
  0x36   : > { %1957 = vmatpush3.bf16.msra.mxu1 %v2070_v30 }
  0x37   : > { %838 = vmatmul.mubr.bf16.gmra.mxu0 %v1685_v39  ;;  %1958 = vmatprep.subr.bf16.mxu1 %v2074_v46 }
  0x38   : > { %1863 = vmatpush3.bf16.msra.mxu0 %v2073_v35  ;;  %1083 = vmatprep.mubr.bf16.mxu0 %v1713_v41 }
  0x39   : > { %1864 = vmatprep.subr.bf16.mxu0 %v2075_v40 }
  0x3a   : > { %1959 = vmatpush3.bf16.msra.mxu1 %v2074_v46 }
  0x3b   : > { %1960 = vmatprep.subr.bf16.mxu1 %v2077_v38 }
  0x3c   : > { %1865 = vmatpush3.bf16.msra.mxu0 %v2076_v47 }
  0x3d   : > { %1866 = vmatprep.subr.bf16.mxu0 %v2078_v22 }
  0x3e   : > { %1961 = vmatpush3.bf16.msra.mxu1 %v2077_v38 }
  0x3f   : > { %1962 = vmatprep.subr.bf16.mxu1 %v2080_v50 }
  0x40   : > { %1867 = vmatpush3.bf16.msra.mxu0 %v2079_v48 }
  0x41   : > { %1868 = vmatprep.subr.bf16.mxu0 %v2081_v49 }
  0x42   : > { %1963 = vmatpush3.bf16.msra.mxu1 %v2080_v50 }
  0x43   : > { %1964 = vmatprep.subr.bf16.mxu1 %v2083_v55 }
  0x44   : > { %1869 = vmatpush3.bf16.msra.mxu0 %v2082_v52 }
  0x45   : > { %1870 = vmatprep.subr.bf16.mxu0 %v2084_v54 }
  0x46   : > { %1965 = vmatpush3.bf16.msra.mxu1 %v2083_v55 }
  0x47   : > { %1966 = vmatprep.subr.bf16.mxu1 %v2086_v59 }
  0x48   : > { %1871 = vmatpush3.bf16.msra.mxu0 %v2085_v57 }
  0x49   : > { %1872 = vmatprep.subr.bf16.mxu0 %v2087_v58 }
  0x4a   : > { %1967 = vmatpush3.bf16.msra.mxu1 %v2086_v59 }
  0x4b   : > { %1968 = vmatprep.subr.bf16.mxu1 %v2089_v1 }
  0x4c   : > { %1873 = vmatpush3.bf16.msra.mxu0 %v2088_v53 }
  0x4d   : > { %1896 = vmatprep.subr.bf16.mxu0 %v2090_v0 }
  0x4e   : > { %1969 = vmatpush3.bf16.msra.mxu1 %v2089_v1 }
  0x4f   : > { %1084 = vmatmul.mubr.bf16.vlgmr.msra.gmra.mxu0 %v1712_v2  ;;  %1974 = vmatprep.subr.bf16.mxu1 %v2092_v60 }
  0x50   : > { %1897 = vmatpush3.bf16.msra.mxu0 %v2091_v3  ;;  %1091 = vmatprep.mubr.bf16.mxu0 %v1716_v62 }
  0x51   : > { %1898 = vmatprep.subr.bf16.mxu0 %v2093_v45  ;;  %1971 = vmatmul.mubr.bf16.vlgmr.msra.gmra.mxu1 %v1717_v23 }
  0x52   : > { %1975 = vmatpush3.bf16.msra.mxu1 %v2092_v60  ;;  %1990 = vmatprep.mubr.bf16.mxu1 %v1717_v23 }
  0x53   : > { %1976 = vmatprep.subr.bf16.mxu1 %v2095_v24 }
  0x54   : > { %1899 = vmatpush3.bf16.msra.mxu0 %v2094_v4 }
  0x55   : > { %1900 = vmatprep.subr.bf16.mxu0 %v2097_v6 }
  0x56   : > { %1977 = vmatpush3.bf16.msra.mxu1 %v2095_v24 }
  0x57   : > { %1092 = vmatmul.mubr.bf16.gmra.mxu0 %v1715_v7  ;;  %1978 = vmatprep.subr.bf16.mxu1 %v2099_v61 }
  0x58   : > { %1901 = vmatpush3.bf16.msra.mxu0 %v2098_v8  ;;  %1384 = vmatprep.mubr.bf16.mxu0 %v1716_v62 }
  0x59   : > { %1902 = vmatprep.subr.bf16.mxu0 %v2100_v9 }
  0x5a   : > { %1979 = vmatpush3.bf16.msra.mxu1 %v2099_v61 }
  0x5b   : > { %1980 = vmatprep.subr.bf16.mxu1 %v2102_v11 }
  0x5c   : > { %1903 = vmatpush3.bf16.msra.mxu0 %v2101_v5 }
  0x5d   : > { %1904 = vmatprep.subr.bf16.mxu0 %v2103_v10  ;;  %v1817_v10 = vld [vmem:[%s2600_s4] ss:$0 sm:$0xff] }
  0x5e   : > { %1981 = vmatpush3.bf16.msra.mxu1 %v2102_v11 }
  0x5f   : > { %1982 = vmatprep.subr.bf16.mxu1 %v2105_v14 }
  0x60   : > { %1905 = vmatpush3.bf16.msra.mxu0 %v2104_v12 }
  0x61   : > { %1906 = vmatprep.subr.bf16.mxu0 %v2106_v13 }
  0x62   : > { %1983 = vmatpush3.bf16.msra.mxu1 %v2105_v14 }
  0x63   : > { %1984 = vmatprep.subr.bf16.mxu1 %v2108_v17 }
  0x64   : > { %1907 = vmatpush3.bf16.msra.mxu0 %v2107_v15 }
  0x65   : > { %1908 = vmatprep.subr.bf16.mxu0 %v2109_v16 }
  0x66   : > { %1985 = vmatpush3.bf16.msra.mxu1 %v2108_v17 }
  0x67   : > { %1986 = vmatprep.subr.bf16.mxu1 %v2111_v20 }
  0x68   : > { %1909 = vmatpush3.bf16.msra.mxu0 %v2110_v18 }
  0x69   : > { %1910 = vmatprep.subr.bf16.mxu0 %v2112_v19 }
  0x6a   : > { %1987 = vmatpush3.bf16.msra.mxu1 %v2111_v20 }
  0x6b   : > { %1988 = vmatprep.subr.bf16.mxu1 %v2114_v26 }
  0x6c   : > { %1911 = vmatpush3.bf16.msra.mxu0 %v2113_v25 }
  0x6e   : > { %1989 = vmatpush3.bf16.msra.mxu1 %v2114_v26 }
  0x6f   : > { %1385 = vmatmul.mubr.bf16.vlgmr.msra.gmra.mxu0 %v1715_v7 }
  0x70   : > { %1392 = vmatprep.mubr.bf16.mxu0 %v1791_v21 }
  0x71   : > { %1991 = vmatmul.mubr.bf16.vlgmr.msra.gmra.mxu1 %v2433_v44 }
  0x77   : > { %1393 = vmatmul.mubr.bf16.gmra.mxu0 %v2431_v42 }
  0xef   : > { %v1836_v28 = vpop.f32.mrf.mxu0 }
  0xf1   : > { %v1837_v29 = vpop.f32.mrf.mxu0  ;;  %v1952_v41 = vpop.f32.mrf.mxu1 }
  0xf2   : > { %v1838_v48 = vadd.f32 %v1837_v29, %v1836_v28 }
  0xf3   : > { %v1839_v30 = vpop.f32.mrf.mxu0  ;;  %v880_v27 = vpop.f32.mrf.mxu1 }
  0xf4   : > { %v881_v55 = vadd.f32 %v1838_v48, %v880_v27 }
  0xf5   : > { %v1840_v31 = vpop.f32.mrf.mxu0  ;;  %v1953_v21 = vpop.f32.mrf.mxu1 }
  0xf6   : > { %v1841_v56 = vadd.f32 %v1840_v31, %v1839_v30 }
  0xf7   : > { %v1842_v33 = vpop.f32.mrf.mxu0  ;;  %v883_v44 = vpop.f32.mrf.mxu1 }
  0xf8   : > { %v884_v62 = vadd.f32 %v1841_v56, %v883_v44 }
  0xf9   : > { %v1843_v34 = vpop.f32.mrf.mxu0 }
  0xfa   : > { %v1844_v54 = vadd.f32 %v1843_v34, %v1842_v33 }
  0xfb   : > { %v1845_v35 = vpop.f32.mrf.mxu0 }
  0xfc   : > { %v889_v2 = vadd.f32 %v1952_v41, %v1844_v54 }
  0xfd   : > { %v1846_v36 = vpop.f32.mrf.mxu0 }
  0xfe   : > { %v1847_v3 = vadd.f32 %v1846_v36, %v1845_v35 }
 0x100   : > { %v892_v5 = vadd.f32 %v1953_v21, %v1847_v3 }
 0x10f   : > { %v1874_v37 = vpop.f32.mrf.mxu0 }
 0x111   : > { %v1875_v39 = vpop.f32.mrf.mxu0  ;;  %v1972_v47 = vpop.f32.mrf.mxu1 }
 0x112   : > { %v1876_v51 = vadd.f32 %v1875_v39, %v1874_v37 }
 0x113   : > { %v1877_v40 = vpop.f32.mrf.mxu0  ;;  %v1134_v22 = vpop.f32.mrf.mxu1 }
 0x114   : > { %v1086_v63 = vadd.f32 %v1876_v51, %v881_v55 }
 0x115   : > { %v1878_v43 = vpop.f32.mrf.mxu0  ;;  %v1973_v50 = vpop.f32.mrf.mxu1 }
 0x116   : > { %v1879_v53 = vadd.f32 %v1878_v43, %v1877_v40  ;;  %v1135_v24 = vadd.f32 %v1134_v22, %v1086_v63 }
 0x117   : > { %v1880_v32 = vpop.f32.mrf.mxu0  ;;  %v1137_v59 = vpop.f32.mrf.mxu1 }
 0x118   : > { %v1089_v7 = vadd.f32 %v1879_v53, %v884_v62 }
 0x119   : > { %v1881_v46 = vpop.f32.mrf.mxu0 }
 0x11a   : > { %v1882_v58 = vadd.f32 %v1881_v46, %v1880_v32  ;;  %v1138_v19 = vadd.f32 %v1137_v59, %v1089_v7 }
 0x11b   : > { %v1883_v42 = vpop.f32.mrf.mxu0 }
 0x11c   : > { %v1094_v4 = vadd.f32 %v1882_v58, %v889_v2 }
 0x11d   : > { %v1884_v38 = vpop.f32.mrf.mxu0 }
 0x11e   : > { %v1885_v6 = vadd.f32 %v1884_v38, %v1883_v42  ;;  %v1143_v15 = vadd.f32 %v1972_v47, %v1094_v4 }
 0x120   : > { %v1097_v16 = vadd.f32 %v1885_v6, %v892_v5 }
 0x122   : > { %v1146_v33 = vadd.f32 %v1973_v50, %v1097_v16 }
 0x12f   : > { %v1912_v49 = vpop.f32.mrf.mxu0 }
 0x131   : > { %v1913_v52 = vpop.f32.mrf.mxu0  ;;  %v1992_v45 = vpop.f32.mrf.mxu1 }
 0x132   : > { %v1914_v0 = vadd.f32 %v1913_v52, %v1912_v49 }
 0x133   : > { %v1915_v57 = vpop.f32.mrf.mxu0  ;;  %v1435_v23 = vpop.f32.mrf.mxu1 }
 0x134   : > { %v1436_v8 = vadd.f32 %v1914_v0, %v1435_v23 }
 0x135   : > { %v1916_v1 = vpop.f32.mrf.mxu0  ;;  %v1993_v11 = vpop.f32.mrf.mxu1 }
 0x136   : > { %v1917_v9 = vadd.f32 %v1916_v1, %v1915_v57  ;;  %v1450_v13 = vadd.f32 %v1436_v8, %v1135_v24 }
 0x137   : > { %v1918_v60 = vpop.f32.mrf.mxu0  ;;  %v1438_v17 = vpop.f32.mrf.mxu1 }
 0x138   : > { %v1461_v20 = vadd.f32 %v1817_v10, %v1450_v13  ;;  %v1439_v25 = vadd.f32 %v1917_v9, %v1438_v17 }
 0x139   : > { %v1919_v61 = vpop.f32.mrf.mxu0 }
 0x13a   : > { %v1920_v12 = vadd.f32 %v1919_v61, %v1918_v60  ;;  %v1465_v30 = vmax.f32 %v1461_v20, 0.0  ;;  %v1451_v31 = vadd.f32 %v1439_v25, %v1138_v19 }
 0x13b   : > { %v1921_v14 = vpop.f32.mrf.mxu0 }
 0x13c   : > { %v1444_v18 = vadd.f32 %v1992_v45, %v1920_v12  ;;  %v1469_v36 = vpack.c.bf16 %v1465_v30, %v1465_v30  ;;  %v1462_v37 = vadd.f32 %v1817_v10, %v1451_v31 }
 0x13d   : > { %v1922_v26 = vpop.f32.mrf.mxu0 }
 0x13e   : > { %v1452_v28 = vadd.f32 %v1444_v18, %v1143_v15  ;;  %v1923_v29 = vadd.f32 %v1922_v26, %v1921_v14  ;;  %1474 = vst.msk [vmem:[%s401_s30] sm:$0xf] %vm1473_vm6, %v1469_v36  ;;  %v1466_v41 = vmax.f32 %v1462_v37, 0.0 }
 0x140   : > { %v1463_v34 = vadd.f32 %v1817_v10, %v1452_v28  ;;  %v1447_v35 = vadd.f32 %v1993_v11, %v1923_v29  ;;  %v1470_v32 = vpack.c.bf16 %v1466_v41, %v1466_v41 }
 0x142   : > { %v1467_v39 = vmax.f32 %v1463_v34, 0.0  ;;  %v1453_v40 = vadd.f32 %v1447_v35, %v1146_v33  ;;  %1475 = vst.msk [vmem:[%s401_s30 + $0x4] sm:$0xf] %vm1473_vm6, %v1470_v32 }
 0x144   : > { %v1471_v43 = vpack.c.bf16 %v1467_v39, %v1467_v39  ;;  %v1464_v27 = vadd.f32 %v1817_v10, %v1453_v40 }
 0x146   : > { %1476 = vst.msk [vmem:[%s401_s30 + $0x8] sm:$0xf] %vm1473_vm6, %v1471_v43  ;;  %v1468_v21 = vmax.f32 %v1464_v27, 0.0 }
 0x148   : > { %v1472_v46 = vpack.c.bf16 %v1468_v21, %v1468_v21 }
 0x14a   : > { %1477 = vst.msk [vmem:[%s401_s30 + $0xc] sm:$0xf] %vm1473_vm6, %v1472_v46 }
 0x14b PF: > { %s15_s22 = sadd.s32 1, %s2153_s22   ;;  %s2606_s18 = smov %s2145_s20 }
 0x14c   : > { %p12_p9 = scmp.ge.s32.totalorder %s15_s22, 6   ;;  %s2607_s19 = smov %s2149_s21 }
 0x14d   : > { %s2608_s20 = smov %s2611_s23  ;;  %s2609_s21 = smov %s2615_s24 }
 0x14e   :  { %14 = sbr.rel (!%p12_p9) target bundleno = 3 (0x3), region = 78 }

// kernel: decoder2_forward.5
= control target key start
LH: loop header
LB: loop body
LE: loop exit
PB: predicated region body
PF: predicated region fallthrough
CT: control target
= control target key end

     0   :  { %s1973_s18 = smov 0   ;;  %s1975_s19 = smov 0   ;;  %s2783_s0 = inlined_call_operand.vmem [shape: bf16[2,16,16,64], index: 0, kind: input, shape index: {}, may-alias: {0,1,2}]   ;;  %s2784_s1 = inlined_call_operand.vmem [shape: bf16[2,16,16,64], index: 1, kind: input, shape index: {}, may-alias: {0,1,2}]   ;;  %s2785_s2 = inlined_call_operand.vmem [shape: bf16[2,16,16,64], index: 2, kind: input, shape index: {}, may-alias: {0,1,2}]   ;;  %s2786_s3 = inlined_call_operand.vmem [shape: bf16[3,192,3], index: 3, kind: input, shape index: {}]   ;;  %s2787_s4 = inlined_call_operand.vmem [shape: f32[1,3], index: 4, kind: input, shape index: {}]   ;;  %s2788_s5 = inlined_call_operand.vmem [shape: f32[2,16,16,3], index: 5, kind: output, shape index: {}]  }
   0x1   :  { %s1977_s20 = smov 0   ;;  %s1979_s21 = smov 0  }
   0x2   :  { %s1981_s22 = smov 0  }
   0x3 LB: > { %s24_s23 = sadd.s32 1, %s1931_s20  ;;  %s27_s24 = sadd.s32 1, %s1935_s21  ;;  %s1939_s22 = sphi %s1981_s22, %s15_s22   ;;  %s1935_s21 = sphi %s1979_s21, %s2796_s21   ;;  %s1931_s20 = sphi %s1977_s20, %s2795_s20   ;;  %s1927_s19 = sphi %s1975_s19, %s2794_s19   ;;  %s1923_s18 = sphi %s1973_s18, %s2793_s18  }
   0x4   : > { %p25_p0 = scmp.ge.s32.totalorder %s24_s23, 2  ;;  %p1610_p1 = scmp.ge.s32.totalorder %s1939_s22, 1 }
   0x5   : > { %p285_p2 = scmp.lt.s32.totalorder %s1939_s22, 5 }
   0x6   : > { %s2798_s23 = smov (%p25_p0, %s24_s23), 0  ;;  %s2800_s24 = smov (!%p25_p0, %s27_s24), %s1935_s21 }
   0x7   : > { %p286_p3 = pnand %p1610_p1, %p285_p2  ;;  %p29_p4 = scmp.ge.s32.totalorder %s2800_s24, 2 }
   0x8   : > { %s2005_s25 = sshll.u32 (!%p286_p3), %s1923_s18, 3  ;;  %p357_p5 = scmp.lt.s32.totalorder (!%p286_p3), %s1927_s19, 1 }
   0x9   : > { %s2802_s24 = smov (%p29_p4, %s2800_s24), 0  ;;  %289 = sbr.rel (%p286_p3) target bundleno = 436 (0x1b4), region = 40 }
   0xa   : > { %s1612_s28 = sadd.s32 (!%p286_p3), 4294967295, %s2005_s25  ;;  %p374_p6 = scmp.lt.s32.totalorder (!%p286_p3), %s2005_s25, 15 }
   0xb   : > { %s354_s29 = sshra.s32 (!%p286_p3), %s1612_s28, 31  ;;  %s383_s16 = ssub.s32 (!%p286_p3), 7, %s2005_s25 }
   0xc   : > { %s355_s9 = sadd.s32 (!%p286_p3), %s1612_s28, %s354_s29 }
   0xd   : > { %s356_s10 = sxor.u32 (!%p286_p3), %s355_s9, %s354_s29  ;;  %s2048_s29 = sshra.s32 (!%p286_p3), %s383_s16, 31 }
   0xe   : > { %v1860_v0 = vld [vmem:[%s2786_s3 + $0x38] sm:$0xff]   ;;  %v1941_v1 = vmov 0   ;;  %v1862_v3 = vld [vmem:[%s2786_s3 + $0x30] sm:$0xff]   ;;  %s2804_s19 = smov (!%p357_p5, %s1927_s19), 1  ;;  %p359_p7 = scmp.lt.s32.totalorder %s356_s10, 15  ;;  %v1864_v5 = vld [vmem:[%s2786_s3 + $0x28] sm:$0xff]  }
   0xf   : > { %1109 = vmatprep.subr.bf16.mxu1 %v1941_v1  ;;  %937 = vmatprep.subr.bf16.mxu0 %v1941_v1  ;;  %v1861_v2 = vld [vmem:[%s2786_s3 + $0x98] sm:$0xff]   ;;  %v1863_v4 = vld [vmem:[%s2786_s3 + $0x90] sm:$0xff]   ;;  %s2032_s15 = sshll.u32 %s2804_s19, 5  ;;  %v1865_v6 = vld [vmem:[%s2786_s3 + $0x88] sm:$0xff]   ;;  %s1942_s9 = smov 64   ;;  %vm718_vm0 = vcmask 1047552  }
  0x10   : > { %1110 = vmatpush1.bf16.msra.mxu1 %v1860_v0  ;;  %938 = vmatpush1.bf16.msra.mxu0 %v1861_v2  ;;  %s2806_s10 = smov (!%p359_p7, %s356_s10), 15  ;;  %v1866_v7 = vld [vmem:[%s2786_s3 + $0x20] sm:$0xff]   ;;  %v1868_v9 = vld [vmem:[%s2786_s3 + $0x18] sm:$0xff]   ;;  %v1873_v26 = vld [vmem:[%s2786_s3 + $0x10] sm:$0xff]   ;;  %vm719_vm1 = vsmask.f32 7424 }
  0x11   : > { %1111 = vmatprep.subr.bf16.mxu1 %v1941_v1  ;;  %939 = vmatprep.subr.bf16.mxu0 %v1941_v1  ;;  %s375_s26 = scalar_select %p374_p6, %s2005_s25, 15  ;;  %v1867_v8 = vld [vmem:[%s2786_s3 + $0x80] sm:$0xff]   ;;  %v1869_v12 = vld [vmem:[%s2786_s3 + $0x78] sm:$0xff]   ;;  %v1874_v35 = vld [vmem:[%s2786_s3 + $0x70] sm:$0xff]   ;;  %vm751_vm2 = vcmask 523264   ;;  %vm615_vm4 = vcmask 1040384  }
  0x12   : > { %s1613_s27 = sshll.u32 %s2806_s10, 1  ;;  %v1875_v45 = vld [vmem:[%s2786_s3 + $0x8] sm:$0xff]   ;;  %v1877_v62 = vld [vmem:[%s2786_s3] sm:$0xff]   ;;  %vm2257_vm3 = vmand %vm718_vm0, %vm719_vm1  ;;  %vm616_vm5 = vsmask.f32 256  ;;  %vm1442_vm7 = vcmask 23552  }
  0x13   : > { %s363_s30 = sadd.s32 %s2032_s15, %s1613_s27  ;;  %s1617_s6 = sshll.u32 %s375_s26, 1  ;;  %v1876_v51 = vld [vmem:[%s2786_s3 + $0x68] sm:$0xff]   ;;  %vm2268_vm6 = vmand %vm615_vm4, %vm616_vm5 }
  0x14   : > { %1112 = vmatpush1.bf16.msra.mxu1 %v1862_v3  ;;  %940 = vmatpush1.bf16.msra.mxu0 %v1863_v4  ;;  %s1615_s7 = sshll.u32 %s363_s30, 2  ;;  %s2053_s8 = sadd.s32 %s1617_s6, %s2032_s15 }
  0x15   : > { %1113 = vmatprep.subr.bf16.mxu1 %v1941_v1  ;;  %941 = vmatprep.subr.bf16.mxu0 %v1941_v1  ;;  %s365_s13 = scalar_lea.vmem %s2783_s0, %s1615_s7  ;;  %s1619_s14 = sshll.u32 %s2053_s8, 2 }
  0x16   : > { %s2069_s28 = scalar_lea.vmem %s2784_s1, %s1619_s14  ;;  %v415_v10 = vld [vmem:[%s365_s13] sm:$0xf]  ;;  %v2071_v11 = vld [vmem:[%s365_s13 + $0x4] sm:$0xf]  ;;  %s385_s6 = sadd.s32 %s2048_s29, %s383_s16 }
  0x17   : > { %v2077_v13 = vcombine.low %v415_v10, %v2071_v11  ;;  %v1628_v14 = vcombine.low %v415_v10, %v415_v10  ;;  %v417_v15 = vld [vmem:[%s2069_s28] sm:$0xf]  ;;  %v2081_v16 = vld [vmem:[%s2069_s28 + $0x4] sm:$0xf]  ;;  %v419_v17 = vld [vmem:[%s2069_s28 + $0x8] sm:$0xf]  ;;  %s386_s7 = sxor.u32 %s385_s6, %s2048_s29 }
  0x18   : > { %1114 = vmatpush1.bf16.msra.mxu1 %v1864_v5  ;;  %942 = vmatpush1.bf16.msra.mxu0 %v1865_v6  ;;  %v1629_v18 = vcombine.low %v417_v15, %v417_v15  ;;  %v420_v19 = vld [vmem:[%s2069_s28 + $0xc] sm:$0xf]  ;;  %v1630_v20 = vcombine.low %v419_v17, %v419_v17  ;;  %v421_v21 = vld [vmem:[%s2069_s28 + $0x10] sm:$0xf]  ;;  %v422_v22 = vld [vmem:[%s2069_s28 + $0x14] sm:$0xf]  ;;  %v2095_v23 = vcombine.low %v417_v15, %v2081_v16 }
  0x19   : > { %1115 = vmatprep.subr.bf16.mxu1 %v1941_v1  ;;  %943 = vmatprep.subr.bf16.mxu0 %v1941_v1  ;;  %v2097_v24 = vcombine.low %v419_v17, %v420_v19  ;;  %v1650_v25 = vcombine.low %v420_v19, %v420_v19  ;;  %v2103_v27 = vshrl.u32 %v1628_v14, 16  ;;  %v1631_v28 = vcombine.low %v421_v21, %v421_v21  ;;  %v423_v29 = vld [vmem:[%s2069_s28 + $0x18] sm:$0xf]  ;;  %v424_v30 = vld [vmem:[%s2069_s28 + $0x1c] sm:$0xf]  ;;  %s387_s29 = ssub.s32 15, %s386_s7 }
  0x1a   : > { %731 = vrot.lane.b32.xlu0 %v2077_v13, %s1942_s9  ;;  %v539_v31 = vshll.u32 %v2077_v13, 16  ;;  %v2108_v32 = vshrl.u32 %v1629_v18, 16  ;;  %v2114_v34 = vcombine.low %v421_v21, %v422_v22  ;;  %p390_p8 = scmp.lt.s32.totalorder %s387_s29, 15  ;;  %v546_v36 = vshll.u32 %v2095_v23, 16  ;;  %v425_v39 = vld [vmem:[%s2069_s28 + $0x20] sm:$0xf] }
  0x1b   : > { %v2110_v33 = vshll.u32 %v1650_v25, 16  ;;  %735 = vrot.lane.b32.xlu1 %v2097_v24, %s1942_s9  ;;  %v2121_v37 = vshrl.u32 %v1630_v20, 16  ;;  %v1651_v38 = vcombine.low %v422_v22, %v422_v22  ;;  %v426_v40 = vld [vmem:[%s2069_s28 + $0x24] sm:$0xf]  ;;  %v550_v41 = vshrl.u32 %v2097_v24, 16  ;;  %v1879_v21 = vld [vmem:[%s2786_s3 + $0x58] sm:$0xff]  }
  0x1c   : > { %1116 = vmatpush1.bf16.msra.mxu1 %v1866_v7  ;;  %944 = vmatpush1.bf16.msra.mxu0 %v1867_v8  ;;  %v553_v42 = vshll.u32 %v2097_v24, 16  ;;  %v2129_v43 = vcombine.low %v423_v29, %v424_v30  ;;  %v1652_v44 = vcombine.low %v424_v30, %v424_v30  ;;  %s2808_s29 = smov (!%p390_p8, %s387_s29), 15  ;;  %v2136_v47 = vshrl.u32 %v1631_v28, 16  ;;  %v427_v49 = vld [vmem:[%s2069_s28 + $0x28] sm:$0xf]  ;;  %v1878_v8 = vld [vmem:[%s2786_s3 + $0x60] sm:$0xff]  }
  0x1d   : > { %1117 = vmatprep.subr.bf16.mxu1 %v1941_v1  ;;  %945 = vmatprep.subr.bf16.mxu0 %v1941_v1  ;;  %v679_v46 = vrot.slane %v2110_v33, 4  ;;  %v1632_v48 = vcombine.low %v423_v29, %v423_v29  ;;  %v428_v50 = vld [vmem:[%s2069_s28 + $0x2c] sm:$0xf]  ;;  %v557_v52 = vshrl.u32 %v2114_v34, 16  ;;  %v560_v53 = vshll.u32 %v2114_v34, 16  ;;  %s1621_s18 = sshll.u32 %s2808_s29, 1 }
  0x1e   : > { %733 = vrot.lane.b32.xlu0 %v2095_v23, %s1942_s9  ;;  %v2145_v54 = vshll.u32 %v1651_v38, 16  ;;  %v2149_v55 = vcombine.low %v425_v39, %v426_v40  ;;  %v2152_v56 = vld [vmem:[%s2069_s28 + $0x30] sm:$0xf]  ;;  %v430_v57 = vld [vmem:[%s2069_s28 + $0x34] sm:$0xf]  ;;  %s394_s26 = sadd.s32 %s1621_s18, %s2032_s15  ;;  %v2157_v58 = vshll.u32 %v1652_v44, 16  ;;  %v1653_v59 = vcombine.low %v426_v40, %v426_v40 }
  0x1f   : > { %737 = vrot.lane.b32.xlu1 %v2114_v34, %s1942_s9  ;;  %v2161_v60 = vcombine.low %v427_v49, %v428_v50  ;;  %v1654_v61 = vcombine.low %v428_v50, %v428_v50  ;;  %s1623_s27 = sshll.u32 %s394_s26, 2  ;;  %v1633_v63 = vcombine.low %v425_v39, %v425_v39  ;;  %v2168_v0 = vld [vmem:[%s2069_s28 + $0x38] sm:$0xf]  ;;  %v2171_v2 = vld [vmem:[%s2069_s28 + $0x3c] sm:$0xf]  ;;  %v2176_v3 = vshrl.u32 %v1632_v48, 16 }
  0x20   : > { %1118 = vmatpush1.bf16.msra.mxu1 %v1868_v9  ;;  %946 = vmatpush1.bf16.msra.mxu0 %v1869_v12  ;;  %s396_s7 = scalar_lea.vmem %s2785_s2, %s1623_s27  ;;  %v564_v4 = vshrl.u32 %v2129_v43, 16  ;;  %v567_v5 = vshll.u32 %v2129_v43, 16  ;;  %v2183_v6 = vcombine.low %v2152_v56, %v430_v57  ;;  %v1634_v9 = vcombine.low %v427_v49, %v427_v49  ;;  %v1881_v40 = vld [vmem:[%s2786_s3 + $0x50] sm:$0xff]   ;;  %s1627_s11 = sshll.u32 %s2053_s8, 3 }
  0x21   : > { %1119 = vmatprep.subr.bf16.mxu1 %v1941_v1  ;;  %947 = vmatprep.subr.bf16.mxu0 %v1941_v1  ;;  %v2185_v7 = vld [vmem:[%s396_s7] sm:$0xf]  ;;  %v2191_v10 = vld [vmem:[%s396_s7 + $0x4] sm:$0xf]  ;;  %v683_v12 = vrot.slane %v2145_v54, 4  ;;  %v2194_v14 = vshll.u32 %v1653_v59, 16  ;;  %v2202_v17 = vcombine.low %v2168_v0, %v2171_v2  ;;  %v1655_v30 = vcombine.low %v430_v57, %v430_v57  ;;  %s2696_s17 = scalar_lea.vmem %s2788_s5, %s1627_s11 }
  0x22   : > { %739 = vrot.lane.b32.xlu0 %v2129_v43, %s1942_s9  ;;  %v2196_v15 = vshll.u32 %v1654_v61, 16  ;;  %v687_v18 = vrot.slane %v2157_v58, 4  ;;  %v2206_v19 = vshrl.u32 %v1633_v63, 16  ;;  %v571_v20 = vshrl.u32 %v2149_v55, 16  ;;  %v1882_v49 = vld [vmem:[%s2786_s3 + $0xb0] sm:$0xff]   ;;  %v1883_v57 = vld [vmem:[%s2786_s3 + $0x48] sm:$0xff]  }
  0x23   : > { %741 = vrot.lane.b32.xlu1 %v2149_v55, %s1942_s9  ;;  %v574_v22 = vshll.u32 %v2149_v55, 16  ;;  %v2217_v25 = vcombine.low %v2185_v7, %v2191_v10  ;;  %v2223_v28 = vshrl.u32 %v1634_v9, 16  ;;  %v578_v29 = vshrl.u32 %v2161_v60, 16  ;;  %v1884_v9 = vld [vmem:[%s2786_s3 + $0xa8] sm:$0xff]  }
  0x24   : > { %1120 = vmatpush1.bf16.msra.mxu1 %v1873_v26  ;;  %948 = vmatpush1.bf16.msra.mxu0 %v1874_v35  ;;  %v1880_v26 = vld [vmem:[%s2786_s3 + $0xb8] sm:$0xff]   ;;  %v691_v35 = vrot.slane %v2194_v14, 4  ;;  %v581_v38 = vshll.u32 %v2161_v60, 16  ;;  %v695_v39 = vrot.slane %v2196_v15, 4  ;;  %v1648_v44 = vcombine.low %v2071_v11, %v2071_v11 }
  0x25   : > { %1121 = vmatprep.subr.bf16.mxu1 %v1941_v1  ;;  %949 = vmatprep.subr.bf16.mxu0 %v1941_v1  ;;  %v588_v48 = vshll.u32 %v2183_v6, 16  ;;  %v2245_v50 = vshll.u32 %v1655_v30, 16  ;;  %v1649_v11 = vcombine.low %v2081_v16, %v2081_v16  ;;  %v628_v59 = vrot.slane %v539_v31, 1  ;;  %v1890_v16 = vld [vmem:[%s2786_s3 + $0xf0] sm:$0xff]  }
  0x26   : > { %743 = vrot.lane.b32.xlu0 %v2161_v60, %s1942_s9  ;;  %v669_v61 = vshll.u32 %v1648_v44, 16  ;;  %v543_v30 = vshrl.u32 %v2095_v23, 16  ;;  %v573_v43 = vrot.slane %v571_v20, 7  ;;  %v592_v15 = vshrl.u32 %v2202_v17, 16 }
  0x27   : > { %745 = vrot.lane.b32.xlu1 %v2183_v6, %s1942_s9  ;;  %v673_v44 = vshll.u32 %v1649_v11, 16 }
  0x28   : > { %1122 = vmatpush1.bf16.msra.mxu1 %v1875_v45  ;;  %950 = vmatpush1.bf16.msra.mxu0 %v1876_v51  ;;  %v585_v45 = vshrl.u32 %v2183_v6, 16  ;;  %v536_v51 = vshrl.u32 %v2077_v13, 16  ;;  %v1885_v13 = vld [vmem:[%s2786_s3 + $0x40] sm:$0xff]  }
  0x29   : > { %1123 = vmatprep.subr.bf16.mxu1 %v1941_v1  ;;  %951 = vmatprep.subr.bf16.mxu0 %v1941_v1  ;;  %v675_v11 = vrot.slane %v673_v44, 4 }
  0x2a   : > { %747 = vrot.lane.b32.xlu0 %v2202_v17, %s1942_s9  ;;  %v629_v63 = vor.u32 %v628_v59, %v536_v51  ;;  %v587_v14 = vrot.slane %v585_v45, 7 }
  0x2b   : > { %749 = vrot.lane.b32.xlu1 %v2217_v25, %s1942_s9 }
  0x2c   : > { %1124 = vmatpush1.bf16.msra.mxu1 %v1877_v62  ;;  %952 = vmatpush1.bf16.msra.mxu0 %v1878_v8  ;;  %v538_v62 = vrot.slane %v536_v51, 7  ;;  %v671_v8 = vrot.slane %v669_v61, 4  ;;  %v545_v51 = vrot.slane %v543_v30, 7  ;;  %v632_v61 = vrot.slane %v553_v42, 1 }
  0x2d   : > { %1133 = vmatprep.subr.bf16.mxu1 %v1941_v1  ;;  %961 = vmatprep.subr.bf16.mxu0 %v1941_v1 }
  0x2e   : > { %v2306_v44 = vor.u32 %v546_v36, %v545_v51 }
  0x30   : > { %1134 = vmatpush2.bf16.msra.mxu1 %v1879_v21  ;;  %962 = vmatpush2.bf16.msra.mxu0 %v1880_v26  ;;  %v2266_v21 = vor.u32 %v539_v31, %v538_v62  ;;  %v634_v62 = vrot.slane %v560_v53, 1  ;;  %v619_v51 = vsel %vm2268_vm6, %v2108_v32, %v2306_v44  ;;  %v1893_v44 = vld [vmem:[%s2786_s3 + $0xd8] sm:$0xff]  }
  0x31   : > { %1135 = vmatprep.subr.bf16.mxu1 %v1941_v1  ;;  %963 = vmatprep.subr.bf16.mxu0 %v1941_v1 }
  0x32   : > { %v618_v31 = vsel %vm2268_vm6, %v2103_v27, %v2266_v21  ;;  %v635_v23 = vor.u32 %v634_v62, %v557_v52 }
  0x34   : > { %1136 = vmatpush2.bf16.msra.mxu1 %v1881_v40  ;;  %964 = vmatpush2.bf16.msra.mxu0 %v1882_v49  ;;  %v630_v40 = vrot.slane %v546_v36, 1  ;;  %v721_v49 = vsel %vm2257_vm3, %v629_v63, %v671_v8  ;;  %v559_v63 = vrot.slane %v557_v52, 7  ;;  %v1635_v8 = vcombine.low %v2152_v56, %v2152_v56 }
  0x35   : > { %1137 = vmatprep.subr.bf16.mxu1 %v1941_v1  ;;  %965 = vmatprep.subr.bf16.mxu0 %v1941_v1  ;;  %v633_v56 = vor.u32 %v632_v61, %v550_v41  ;;  %v566_v36 = vrot.slane %v564_v4, 7  ;;  %v2350_v52 = vsel %vm2257_vm3, %v635_v23, %v683_v12  ;;  %v580_v12 = vrot.slane %v578_v29, 7 }
  0x36   : > { %1714 = vmatprep.mubr.msk.bf16.mxu1 %vm751_vm2, %v721_v49  ;;  %v631_v59 = vor.u32 %v630_v40, %v543_v30  ;;  %v1887_v30 = vld [vmem:[%s2786_s3 + $0xa0] sm:$0xff]   ;;  %v636_v49 = vrot.slane %v567_v5, 1  ;;  %v1637_v23 = vcombine.low %v2185_v7, %v2185_v7 }
  0x37   : > { %v2398_v61 = vor.u32 %v581_v38, %v580_v12 }
  0x38   : > { %1138 = vmatpush2.bf16.msra.mxu1 %v1883_v57  ;;  %v552_v57 = vrot.slane %v550_v41, 7  ;;  %966 = vmatpush2.bf16.msra.mxu0 %v1884_v9  ;;  %v2302_v40 = vsel %vm2257_vm3, %v631_v59, %v675_v11  ;;  %v2329_v59 = vor.u32 %v560_v53, %v559_v63  ;;  %v637_v24 = vor.u32 %v636_v49, %v564_v4 }
  0x39   : > { %1139 = vmatprep.subr.bf16.mxu1 %v1941_v1  ;;  %967 = vmatprep.subr.bf16.mxu0 %v1941_v1  ;;  %v638_v41 = vrot.slane %v574_v22, 1  ;;  %v2354_v53 = vor.u32 %v567_v5, %v566_v36  ;;  %v1656_v4 = vcombine.low %v2171_v2, %v2171_v2  ;;  %v640_v5 = vrot.slane %v581_v38, 1 }
  0x3a   : > { %1694 = vmatprep.mubr.msk.bf16.mxu0 %vm751_vm2, %v2302_v40  ;;  %v2317_v9 = vor.u32 %v553_v42, %v552_v57  ;;  %v2340_v42 = vsel %vm2257_vm3, %v633_v56, %v679_v46  ;;  %v621_v33 = vsel %vm2268_vm6, %v2136_v47, %v2329_v59  ;;  %v2364_v46 = vsel %vm2257_vm3, %v637_v24, %v687_v18  ;;  %v1895_v59 = vld [vmem:[%s2786_s3 + $0xc8] sm:$0xff]  }
  0x3b   : > { %v639_v54 = vor.u32 %v638_v41, %v571_v20  ;;  %v622_v58 = vsel %vm2268_vm6, %v2176_v3, %v2354_v53  ;;  %v2381_v18 = vshrl.u32 %v1635_v8, 16  ;;  %v699_v20 = vrot.slane %v2245_v50, 4  ;;  %v1897_v53 = vld [vmem:[%s2786_s3 + $0x118] sm:$0xff]  }
  0x3c   : > { %1140 = vmatpush2.bf16.msra.mxu1 %v1885_v13  ;;  %v620_v34 = vsel %vm2268_vm6, %v2121_v37, %v2317_v9  ;;  %968 = vmatpush2.bf16.msra.mxu0 %v1887_v30  ;;  %v2392_v13 = vor.u32 %v574_v22, %v573_v43  ;;  %v641_v11 = vor.u32 %v640_v5, %v578_v29  ;;  %v642_v50 = vrot.slane %v588_v48, 1 }
  0x3d   : > { %1769 = vmatprep.subr.bf16.mxu1 %v1941_v1  ;;  %1306 = vmatprep.subr.bf16.mxu0 %v1941_v1  ;;  %v2388_v2 = vsel %vm2257_vm3, %v639_v54, %v691_v35  ;;  %v624_v60 = vsel %vm2268_vm6, %v2223_v28, %v2398_v61  ;;  %v2422_v35 = vor.u32 %v588_v48, %v587_v14  ;;  %v701_v57 = vshll.u32 %v1656_v4, 16 }
  0x3e   : > { %v623_v55 = vsel %vm2268_vm6, %v2206_v19, %v2392_v13  ;;  %v2412_v22 = vsel %vm2257_vm3, %v641_v11, %v695_v39  ;;  %v643_v29 = vor.u32 %v642_v50, %v585_v45  ;;  %v1636_v38 = vcombine.low %v2168_v0, %v2168_v0  ;;  %v1899_v13 = vld [vmem:[%s2786_s3 + $0x108] sm:$0xff]  }
  0x3f   : > { %v595_v39 = vshll.u32 %v2202_v17, 16  ;;  %v625_v45 = vsel %vm2268_vm6, %v2381_v18, %v2422_v35  ;;  %v703_v48 = vrot.slane %v701_v57, 4  ;;  %v594_v8 = vrot.slane %v592_v15, 7 }
  0x40   : > { %v2430_v62 = vsel %vm2257_vm3, %v643_v29, %v699_v20  ;;  %v2436_v6 = vshrl.u32 %v1636_v38, 16  ;;  %v1657_v56 = vcombine.low %v2191_v10, %v2191_v10  ;;  %v599_v36 = vshrl.u32 %v2217_v25, 16  ;;  %v1889_v10 = vld [vmem:[%s2786_s3 + $0xf8] sm:$0xff]   ;;  %v1898_v29 = vld [vmem:[%s2786_s3 + $0x110] sm:$0xff]   ;;  %v1900_v38 = vld [vmem:[%s2786_s3 + $0x100] sm:$0xff]  }
  0x41   : > { %v644_v63 = vrot.slane %v595_v39, 1  ;;  %v2438_v30 = vor.u32 %v595_v39, %v594_v8  ;;  %v602_v24 = vshll.u32 %v2217_v25, 16  ;;  %v2454_v54 = vshrl.u32 %v1637_v23, 16 }
  0x42   : > { %v705_v41 = vshll.u32 %v1657_v56, 16  ;;  %v601_v5 = vrot.slane %v599_v36, 7 }
  0x43   : > { %v645_v0 = vor.u32 %v644_v63, %v592_v15  ;;  %v626_v49 = vsel %vm2268_vm6, %v2436_v6, %v2438_v30  ;;  %v646_v4 = vrot.slane %v602_v24, 1 }
  0x44   : > { %v707_v43 = vrot.slane %v705_v41, 4  ;;  %v2456_v20 = vor.u32 %v602_v24, %v601_v5 }
  0x45   : > { %v2442_v17 = vsel %vm2257_vm3, %v645_v0, %v703_v48  ;;  %v647_v12 = vor.u32 %v646_v4, %v599_v36 }
  0x46   : > { %v627_v7 = vsel %vm2268_vm6, %v2454_v54, %v2456_v20 }
  0x47   : > { %v2460_v11 = vsel %vm2257_vm3, %v647_v12, %v707_v43 }
  0x8c   : > { %v732_v25 = vpop.permute.xlu0 %731 }
  0x8d   : > { %v754_v50 = vsel %vm751_vm2, %v618_v31, %v732_v25  ;;  %v736_v21 = vpop.permute.xlu1 %735  ;;  %v1891_v31 = vld [vmem:[%s2786_s3 + $0xe8] sm:$0xff]  }
  0x8e   : > { %1142 = vmatmul.mubr.bf16.vlgmr.msra.gmra.mxu1 %v754_v50  ;;  %v2500_v32 = vsel %vm751_vm2, %v620_v34, %v736_v21 }
  0x8f   : > { %1781 = vmatpush1.bf16.msra.mxu1 %v1889_v10  ;;  %1715 = vmatprep.mubr.msk.bf16.mxu1 %vm751_vm2, %v2302_v40  ;;  %v1892_v40 = vld [vmem:[%s2786_s3 + $0xe0] sm:$0xff]  }
  0x90   : > { %v734_v14 = vpop.permute.xlu0 %733  ;;  %1770 = vmatprep.subr.bf16.mxu1 %v1941_v1 }
  0x91   : > { %v758_v27 = vsel %vm751_vm2, %v619_v51, %v734_v14  ;;  %v738_v37 = vpop.permute.xlu1 %737  ;;  %v1894_v51 = vld [vmem:[%s2786_s3 + $0xd0] sm:$0xff]  }
  0x92   : > { %970 = vmatmul.mubr.bf16.vlgmr.msra.gmra.mxu0 %v758_v27  ;;  %v2524_v9 = vsel %vm751_vm2, %v621_v33, %v738_v37  ;;  %v1896_v33 = vld [vmem:[%s2786_s3 + $0xc0] sm:$0xff]  }
  0x93   : > { %1307 = vmatpush1.bf16.msra.mxu0 %v1889_v10  ;;  %1782 = vmatpush1.bf16.msra.mxu1 %v1890_v16 }
  0x94   : > { %1308 = vmatprep.subr.bf16.mxu0 %v1941_v1  ;;  %1695 = vmatprep.mubr.msk.bf16.mxu0 %vm751_vm2, %v2340_v42  ;;  %v740_v47 = vpop.permute.xlu0 %739 }
  0x95   : > { %1771 = vmatprep.subr.bf16.mxu1 %v1941_v1  ;;  %v2548_v34 = vsel %vm751_vm2, %v622_v58, %v740_v47  ;;  %v742_v3 = vpop.permute.xlu1 %741 }
  0x96   : > { %1150 = vmatmul.mubr.bf16.gmra.mxu1 %v758_v27  ;;  %v774_v58 = vsel %vm751_vm2, %v623_v55, %v742_v3 }
  0x97   : > { %1309 = vmatpush1.bf16.msra.mxu0 %v1890_v16  ;;  %1716 = vmatprep.mubr.msk.bf16.mxu1 %vm751_vm2, %v2340_v42 }
  0x98   : > { %1310 = vmatprep.subr.bf16.mxu0 %v1941_v1  ;;  %1783 = vmatpush1.bf16.msra.mxu1 %v1891_v31  ;;  %v744_v19 = vpop.permute.xlu0 %743 }
  0x99   : > { %1772 = vmatprep.subr.bf16.mxu1 %v1941_v1  ;;  %v778_v55 = vsel %vm751_vm2, %v624_v60, %v744_v19  ;;  %v746_v28 = vpop.permute.xlu1 %745 }
  0x9a   : > { %978 = vmatmul.mubr.bf16.gmra.mxu0 %v2500_v32  ;;  %v782_v61 = vsel %vm751_vm2, %v625_v45, %v746_v28 }
  0x9b   : > { %1311 = vmatpush1.bf16.msra.mxu0 %v1891_v31  ;;  %1696 = vmatprep.mubr.msk.bf16.mxu0 %vm751_vm2, %v2350_v52 }
  0x9c   : > { %1312 = vmatprep.subr.bf16.mxu0 %v1941_v1  ;;  %1784 = vmatpush1.bf16.msra.mxu1 %v1892_v40  ;;  %v748_v60 = vpop.permute.xlu0 %747 }
  0x9d   : > { %1773 = vmatprep.subr.bf16.mxu1 %v1941_v1 }
  0x9e   : > { %1158 = vmatmul.mubr.bf16.gmra.mxu1 %v2500_v32 }
  0x9f   : > { %1313 = vmatpush1.bf16.msra.mxu0 %v1892_v40  ;;  %1717 = vmatprep.mubr.msk.bf16.mxu1 %vm751_vm2, %v2350_v52 }
  0xa0   : > { %1314 = vmatprep.subr.bf16.mxu0 %v1941_v1  ;;  %1785 = vmatpush1.bf16.msra.mxu1 %v1893_v44 }
  0xa1   : > { %1774 = vmatprep.subr.bf16.mxu1 %v1941_v1 }
  0xa2   : > { %986 = vmatmul.mubr.bf16.gmra.mxu0 %v2524_v9 }
  0xa3   : > { %1315 = vmatpush1.bf16.msra.mxu0 %v1893_v44  ;;  %1697 = vmatprep.mubr.msk.bf16.mxu0 %vm751_vm2, %v2364_v46 }
  0xa4   : > { %1316 = vmatprep.subr.bf16.mxu0 %v1941_v1  ;;  %1786 = vmatpush1.bf16.msra.mxu1 %v1894_v51 }
  0xa5   : > { %1775 = vmatprep.subr.bf16.mxu1 %v1941_v1 }
  0xa6   : > { %1166 = vmatmul.mubr.bf16.gmra.mxu1 %v2524_v9 }
  0xa7   : > { %1718 = vmatprep.mubr.msk.bf16.mxu1 %vm751_vm2, %v2364_v46  ;;  %1317 = vmatpush1.bf16.msra.mxu0 %v1894_v51 }
  0xa8   : > { %1318 = vmatprep.subr.bf16.mxu0 %v1941_v1  ;;  %1787 = vmatpush1.bf16.msra.mxu1 %v1895_v59 }
  0xa9   : > { %1776 = vmatprep.subr.bf16.mxu1 %v1941_v1 }
  0xaa   : > { %994 = vmatmul.mubr.bf16.gmra.mxu0 %v2548_v34 }
  0xab   : > { %1698 = vmatprep.mubr.msk.bf16.mxu0 %vm751_vm2, %v2388_v2  ;;  %1319 = vmatpush1.bf16.msra.mxu0 %v1895_v59 }
  0xac   : > { %1320 = vmatprep.subr.bf16.mxu0 %v1941_v1  ;;  %1788 = vmatpush1.bf16.msra.mxu1 %v1896_v33 }
  0xad   : > { %1777 = vmatprep.subr.bf16.mxu1 %v1941_v1 }
  0xae   : > { %1174 = vmatmul.mubr.bf16.gmra.mxu1 %v2548_v34 }
  0xaf   : > { %1719 = vmatprep.mubr.msk.bf16.mxu1 %vm751_vm2, %v2388_v2  ;;  %1321 = vmatpush1.bf16.msra.mxu0 %v1896_v33 }
  0xb0   : > { %1330 = vmatprep.subr.bf16.mxu0 %v1941_v1  ;;  %1789 = vmatpush2.bf16.msra.mxu1 %v1897_v53 }
  0xb1   : > { %1778 = vmatprep.subr.bf16.mxu1 %v1941_v1 }
  0xb2   : > { %1002 = vmatmul.mubr.bf16.gmra.mxu0 %v774_v58 }
  0xb3   : > { %1699 = vmatprep.mubr.msk.bf16.mxu0 %vm751_vm2, %v2412_v22  ;;  %1331 = vmatpush2.bf16.msra.mxu0 %v1897_v53 }
  0xb4   : > { %1332 = vmatprep.subr.bf16.mxu0 %v1941_v1  ;;  %1790 = vmatpush2.bf16.msra.mxu1 %v1898_v29 }
  0xb5   : > { %1779 = vmatprep.subr.bf16.mxu1 %v1941_v1 }
  0xb6   : > { %1182 = vmatmul.mubr.bf16.gmra.mxu1 %v774_v58 }
  0xb7   : > { %1720 = vmatprep.mubr.msk.bf16.mxu1 %vm751_vm2, %v2412_v22  ;;  %1333 = vmatpush2.bf16.msra.mxu0 %v1898_v29 }
  0xb8   : > { %1334 = vmatprep.subr.bf16.mxu0 %v1941_v1  ;;  %1791 = vmatpush2.bf16.msra.mxu1 %v1899_v13 }
  0xb9   : > { %1780 = vmatprep.subr.bf16.mxu1 %v1941_v1 }
  0xba   : > { %1010 = vmatmul.mubr.bf16.gmra.mxu0 %v778_v55 }
  0xbb   : > { %1700 = vmatprep.mubr.msk.bf16.mxu0 %vm751_vm2, %v2430_v62  ;;  %1335 = vmatpush2.bf16.msra.mxu0 %v1899_v13 }
  0xbc   : > { %1792 = vmatpush2.bf16.msra.mxu1 %v1900_v38  ;;  %1336 = vmatprep.subr.bf16.mxu0 %v1941_v1  ;;  %v786_v1 = vsel %vm751_vm2, %v626_v49, %v748_v60 }
  0xbe   : > { %1190 = vmatmul.mubr.bf16.gmra.mxu1 %v778_v55 }
  0xbf   : > { %1721 = vmatprep.mubr.msk.bf16.mxu1 %vm751_vm2, %v2430_v62  ;;  %1337 = vmatpush2.bf16.msra.mxu0 %v1900_v38 }
  0xc2   : > { %1018 = vmatmul.mubr.bf16.gmra.mxu0 %v782_v61 }
  0xc3   : > { %1701 = vmatprep.mubr.msk.bf16.mxu0 %vm751_vm2, %v2442_v17 }
  0xc6   : > { %1198 = vmatmul.mubr.bf16.gmra.mxu1 %v782_v61 }
  0xc7   : > { %1762 = vmatprep.mubr.msk.bf16.mxu1 %vm751_vm2, %v2412_v22 }
  0xca   : > { %1026 = vmatmul.mubr.bf16.gmra.mxu0 %v786_v1 }
  0xcb   : > { %1758 = vmatprep.mubr.msk.bf16.mxu0 %vm751_vm2, %v2340_v42  ;;  %v750_v42 = vpop.permute.xlu1 %749 }
  0xce   : > { %1371 = vmatmul.mubr.bf16.vlgmr.msra.gmra.mxu1 %v778_v55 }
  0xcf   : > { %1763 = vmatprep.mubr.msk.bf16.mxu1 %vm751_vm2, %v2430_v62 }
  0xd2   : > { %1339 = vmatmul.mubr.bf16.vlgmr.msra.gmra.mxu0 %v2500_v32 }
  0xd3   : > { %1759 = vmatprep.mubr.msk.bf16.mxu0 %vm751_vm2, %v2350_v52  ;;  %v790_v52 = vsel %vm751_vm2, %v627_v7, %v750_v42 }
  0xd6   : > { %1379 = vmatmul.mubr.bf16.gmra.mxu1 %v782_v61 }
  0xd7   : > { %1764 = vmatprep.mubr.msk.bf16.mxu1 %vm751_vm2, %v2442_v17 }
  0xda   : > { %1347 = vmatmul.mubr.bf16.gmra.mxu0 %v2524_v9 }
  0xdb   : > { %1760 = vmatprep.mubr.msk.bf16.mxu0 %vm751_vm2, %v2364_v46 }
  0xde   : > { %1387 = vmatmul.mubr.bf16.gmra.mxu1 %v786_v1 }
  0xdf   : > { %1765 = vmatprep.mubr.msk.bf16.mxu1 %vm751_vm2, %v2460_v11 }
  0xe2   : > { %1355 = vmatmul.mubr.bf16.gmra.mxu0 %v2548_v34 }
  0xe3   : > { %1761 = vmatprep.mubr.msk.bf16.mxu0 %vm751_vm2, %v2388_v2 }
  0xe6   : > { %1395 = vmatmul.mubr.bf16.gmra.mxu1 %v790_v52 }
  0xea   : > { %1363 = vmatmul.mubr.bf16.gmra.mxu0 %v774_v58 }
 0x14e   : > { %v2643_v46 = vpop.f32.mrf.mxu1 }
 0x150   : > { %v1145_v18 = vpop.f32.mrf.mxu1 }
 0x152   : > { %v2645_v22 = vpop.f32.mrf.mxu0  ;;  %v2647_v35 = vpop.f32.mrf.mxu1 }
 0x154   : > { %v973_v15 = vpop.f32.mrf.mxu0  ;;  %v1148_v39 = vpop.f32.mrf.mxu1 }
 0x155   : > { %v2691_v15 = vld [vmem:[%s2787_s4] ss:$0 sm:$0xff] }
 0x156   : > { %v2649_v26 = vpop.f32.mrf.mxu0  ;;  %v2651_v57 = vpop.f32.mrf.mxu1 }
 0x158   : > { %v976_v62 = vpop.f32.mrf.mxu0  ;;  %v1153_v45 = vpop.f32.mrf.mxu1 }
 0x15a   : > { %v2653_v6 = vpop.f32.mrf.mxu0  ;;  %v2655_v2 = vpop.f32.mrf.mxu1 }
 0x15c   : > { %v981_v48 = vpop.f32.mrf.mxu0  ;;  %v1156_v63 = vpop.f32.mrf.mxu1 }
 0x15d   : > { %v1144_v48 = vadd.f32 %v2643_v46, %v2645_v22 }
 0x15e   : > { %v2657_v8 = vpop.f32.mrf.mxu0  ;;  %v2659_v0 = vpop.f32.mrf.mxu1 }
 0x160   : > { %v984_v30 = vpop.f32.mrf.mxu0  ;;  %v1161_v17 = vpop.f32.mrf.mxu1 }
 0x162   : > { %v2661_v49 = vpop.f32.mrf.mxu0  ;;  %v2663_v56 = vpop.f32.mrf.mxu1 }
 0x164   : > { %v989_v23 = vpop.f32.mrf.mxu0  ;;  %v1164_v36 = vpop.f32.mrf.mxu1 }
 0x166   : > { %v2665_v24 = vpop.f32.mrf.mxu0  ;;  %v2667_v41 = vpop.f32.mrf.mxu1 }
 0x168   : > { %v992_v54 = vpop.f32.mrf.mxu0  ;;  %v1169_v43 = vpop.f32.mrf.mxu1 }
 0x16a   : > { %v2669_v4 = vpop.f32.mrf.mxu0  ;;  %v2671_v5 = vpop.f32.mrf.mxu1 }
 0x16c   : > { %v997_v12 = vpop.f32.mrf.mxu0  ;;  %v1172_v20 = vpop.f32.mrf.mxu1 }
 0x16d   : > { %v1147_v20 = vadd.f32 %v2647_v35, %v2649_v26  ;;  %v1152_v35 = vadd.f32 %v2651_v57, %v2653_v6  ;;  %v1155_v57 = vadd.f32 %v2655_v2, %v2657_v8  ;;  %v1160_v2 = vadd.f32 %v2659_v0, %v2661_v49 }
 0x16e   : > { %v2673_v11 = vpop.f32.mrf.mxu0  ;;  %v1175_v7 = vpop.f32.mrf.mxu1  ;;  %v1163_v0 = vadd.f32 %v2663_v56, %v2665_v24  ;;  %v1168_v56 = vadd.f32 %v2667_v41, %v2669_v4 }
 0x16f   : > { %v1171_v4 = vadd.f32 %v2671_v5, %v2673_v11 }
 0x170   : > { %v1000_v10 = vpop.f32.mrf.mxu0  ;;  %v1177_v25 = vpop.f32.mrf.mxu1 }
 0x172   : > { %v1003_v50 = vpop.f32.mrf.mxu0  ;;  %v1178_v16 = vpop.f32.mrf.mxu1 }
 0x173   : > { %v1176_v42 = vadd.f32 %v1175_v7, %v1003_v50 }
 0x174   : > { %v1005_v14 = vpop.f32.mrf.mxu0  ;;  %v1180_v27 = vpop.f32.mrf.mxu1 }
 0x176   : > { %v1006_v21 = vpop.f32.mrf.mxu0  ;;  %v1183_v31 = vpop.f32.mrf.mxu1 }
 0x177   : > { %v1179_v63 = vadd.f32 %v1178_v16, %v1006_v21 }
 0x178   : > { %v1008_v32 = vpop.f32.mrf.mxu0  ;;  %v1185_v40 = vpop.f32.mrf.mxu1 }
 0x17a   : > { %v1011_v37 = vpop.f32.mrf.mxu0  ;;  %v1186_v44 = vpop.f32.mrf.mxu1 }
 0x17b   : > { %v1184_v7 = vadd.f32 %v1183_v31, %v1011_v37 }
 0x17c   : > { %v1013_v9 = vpop.f32.mrf.mxu0  ;;  %v1188_v51 = vpop.f32.mrf.mxu1 }
 0x17e   : > { %v1014_v47 = vpop.f32.mrf.mxu0  ;;  %v1191_v59 = vpop.f32.mrf.mxu1 }
 0x17f   : > { %v1187_v26 = vadd.f32 %v1186_v44, %v1014_v47 }
 0x180   : > { %v1016_v34 = vpop.f32.mrf.mxu0  ;;  %v1193_v33 = vpop.f32.mrf.mxu1 }
 0x182   : > { %v1019_v3 = vpop.f32.mrf.mxu0  ;;  %v2675_v53 = vpop.f32.mrf.mxu1 }
 0x183   : > { %v1192_v6 = vadd.f32 %v1191_v59, %v1019_v3 }
 0x184   : > { %v1021_v58 = vpop.f32.mrf.mxu0  ;;  %v1196_v29 = vpop.f32.mrf.mxu1 }
 0x186   : > { %v2677_v19 = vpop.f32.mrf.mxu0  ;;  %v2679_v13 = vpop.f32.mrf.mxu1 }
 0x187   : > { %v1195_v8 = vadd.f32 %v2675_v53, %v2677_v19 }
 0x188   : > { %v1024_v55 = vpop.f32.mrf.mxu0  ;;  %v1201_v38 = vpop.f32.mrf.mxu1 }
 0x18a   : > { %v2681_v28 = vpop.f32.mrf.mxu0  ;;  %v2683_v61 = vpop.f32.mrf.mxu1 }
 0x18b   : > { %v1200_v49 = vadd.f32 %v2679_v13, %v2681_v28 }
 0x18c   : > { %v1029_v60 = vpop.f32.mrf.mxu0  ;;  %v1204_v1 = vpop.f32.mrf.mxu1 }
 0x18e   : > { %v2686_v52 = vpop.f32.mrf.mxu0  ;;  %v1372_v18 = vpop.f32.mrf.mxu1 }
 0x18f   : > { %v1411_v39 = vadd.f32 %v1372_v18, %v1176_v42  ;;  %v1203_v24 = vadd.f32 %v2683_v61, %v2686_v52 }
 0x190   : > { %v1032_v62 = vpop.f32.mrf.mxu0  ;;  %v1374_v45 = vpop.f32.mrf.mxu1 }
 0x191   : > { %v1434_v30 = vadd.f32 %v2691_v15, %v1411_v39 }
 0x192   : > { %v1340_v17 = vpop.f32.mrf.mxu0  ;;  %v1375_v23 = vpop.f32.mrf.mxu1 }
 0x193   : > { %1451 = vst.msk [vmem:[%s2696_s17 + $0x40] sm:$0xff] %vm1442_vm7, %v1434_v30  ;;  %v1403_v36 = vadd.f32 %v1340_v17, %v1144_v48  ;;  %v1412_v54 = vadd.f32 %v1375_v23, %v1179_v63 }
 0x194   : > { %v1342_v43 = vpop.f32.mrf.mxu0  ;;  %v1377_v12 = vpop.f32.mrf.mxu1 }
 0x195   : > { %v1426_v10 = vadd.f32 %v2691_v15, %v1403_v36  ;;  %v1435_v46 = vadd.f32 %v2691_v15, %v1412_v54 }
 0x196   : > { %v1343_v22 = vpop.f32.mrf.mxu0  ;;  %v1380_v25 = vpop.f32.mrf.mxu1 }
 0x197   : > { %1443 = vst.msk [vmem:[%s2696_s17] sm:$0xff] %vm1442_vm7, %v1426_v10  ;;  %1452 = vst.msk [vmem:[%s2696_s17 + $0x48] sm:$0xff] %vm1442_vm7, %v1435_v46  ;;  %v1404_v50 = vadd.f32 %v1343_v22, %v1147_v20  ;;  %v1413_v16 = vadd.f32 %v1380_v25, %v1184_v7 }
 0x198   : > { %v1345_v14 = vpop.f32.mrf.mxu0  ;;  %v1382_v27 = vpop.f32.mrf.mxu1 }
 0x199   : > { %v1427_v21 = vadd.f32 %v2691_v15, %v1404_v50  ;;  %v1436_v31 = vadd.f32 %v2691_v15, %v1413_v16 }
 0x19a   : > { %v1348_v32 = vpop.f32.mrf.mxu0  ;;  %v1383_v40 = vpop.f32.mrf.mxu1 }
 0x19b   : > { %1444 = vst.msk [vmem:[%s2696_s17 + $0x8] sm:$0xff] %vm1442_vm7, %v1427_v21  ;;  %1453 = vst.msk [vmem:[%s2696_s17 + $0x50] sm:$0xff] %vm1442_vm7, %v1436_v31  ;;  %v1405_v37 = vadd.f32 %v1348_v32, %v1152_v35  ;;  %v1414_v9 = vadd.f32 %v1383_v40, %v1187_v26 }
 0x19c   : > { %v1350_v51 = vpop.f32.mrf.mxu0  ;;  %v1385_v34 = vpop.f32.mrf.mxu1 }
 0x19d   : > { %v1428_v44 = vadd.f32 %v2691_v15, %v1405_v37  ;;  %v1437_v47 = vadd.f32 %v2691_v15, %v1414_v9 }
 0x19e   : > { %v1351_v33 = vpop.f32.mrf.mxu0  ;;  %v1388_v58 = vpop.f32.mrf.mxu1 }
 0x19f   : > { %1445 = vst.msk [vmem:[%s2696_s17 + $0x10] sm:$0xff] %vm1442_vm7, %v1428_v44  ;;  %1454 = vst.msk [vmem:[%s2696_s17 + $0x58] sm:$0xff] %vm1442_vm7, %v1437_v47  ;;  %v1406_v29 = vadd.f32 %v1351_v33, %v1155_v57  ;;  %v1415_v55 = vadd.f32 %v1388_v58, %v1192_v6 }
 0x1a0   : > { %v1353_v38 = vpop.f32.mrf.mxu0  ;;  %v1390_v60 = vpop.f32.mrf.mxu1 }
 0x1a1   : > { %v1429_v59 = vadd.f32 %v2691_v15, %v1406_v29  ;;  %v1438_v3 = vadd.f32 %v2691_v15, %v1415_v55 }
 0x1a2   : > { %v1356_v1 = vpop.f32.mrf.mxu0  ;;  %v1391_v42 = vpop.f32.mrf.mxu1 }
 0x1a3   : > { %1446 = vst.msk [vmem:[%s2696_s17 + $0x18] sm:$0xff] %vm1442_vm7, %v1429_v59  ;;  %1455 = vst.msk [vmem:[%s2696_s17 + $0x60] sm:$0xff] %vm1442_vm7, %v1438_v3  ;;  %v1407_v18 = vadd.f32 %v1356_v1, %v1160_v2  ;;  %v1416_v39 = vadd.f32 %v1391_v42, %v1195_v8 }
 0x1a4   : > { %v1358_v62 = vpop.f32.mrf.mxu0  ;;  %v1393_v45 = vpop.f32.mrf.mxu1 }
 0x1a5   : > { %v1430_v53 = vadd.f32 %v2691_v15, %v1407_v18  ;;  %v1439_v19 = vadd.f32 %v2691_v15, %v1416_v39 }
 0x1a6   : > { %v1359_v48 = vpop.f32.mrf.mxu0  ;;  %v1396_v63 = vpop.f32.mrf.mxu1 }
 0x1a7   : > { %1447 = vst.msk [vmem:[%s2696_s17 + $0x20] sm:$0xff] %vm1442_vm7, %v1430_v53  ;;  %1456 = vst.msk [vmem:[%s2696_s17 + $0x68] sm:$0xff] %vm1442_vm7, %v1439_v19  ;;  %v1408_v30 = vadd.f32 %v1359_v48, %v1163_v0  ;;  %v1417_v17 = vadd.f32 %v1396_v63, %v1200_v49 }
 0x1a8   : > { %v1361_v23 = vpop.f32.mrf.mxu0  ;;  %v1398_v36 = vpop.f32.mrf.mxu1 }
 0x1a9   : > { %v1431_v13 = vadd.f32 %v2691_v15, %v1408_v30  ;;  %v1440_v28 = vadd.f32 %v2691_v15, %v1417_v17 }
 0x1aa   : > { %v1364_v54 = vpop.f32.mrf.mxu0  ;;  %v1399_v43 = vpop.f32.mrf.mxu1 }
 0x1ab   : > { %1448 = vst.msk [vmem:[%s2696_s17 + $0x28] sm:$0xff] %vm1442_vm7, %v1431_v13  ;;  %1457 = vst.msk [vmem:[%s2696_s17 + $0x70] sm:$0xff] %vm1442_vm7, %v1440_v28  ;;  %v1409_v12 = vadd.f32 %v1364_v54, %v1168_v56  ;;  %v1418_v20 = vadd.f32 %v1399_v43, %v1203_v24 }
 0x1ac   : > { %v1366_v7 = vpop.f32.mrf.mxu0  ;;  %v1401_v41 = vpop.f32.mrf.mxu1 }
 0x1ad   : > { %v1432_v61 = vadd.f32 %v2691_v15, %v1409_v12  ;;  %v1441_v52 = vadd.f32 %v2691_v15, %v1418_v20 }
 0x1ae   : > { %v1367_v10 = vpop.f32.mrf.mxu0 }
 0x1af   : > { %1449 = vst.msk [vmem:[%s2696_s17 + $0x30] sm:$0xff] %vm1442_vm7, %v1432_v61  ;;  %1458 = vst.msk [vmem:[%s2696_s17 + $0x78] sm:$0xff] %vm1442_vm7, %v1441_v52  ;;  %v1410_v46 = vadd.f32 %v1367_v10, %v1171_v4 }
 0x1b0   : > { %v1369_v22 = vpop.f32.mrf.mxu0 }
 0x1b1   : > { %v1433_v25 = vadd.f32 %v2691_v15, %v1410_v46 }
 0x1b3   : > { %1450 = vst.msk [vmem:[%s2696_s17 + $0x38] sm:$0xff] %vm1442_vm7, %v1433_v25 }
 0x1b4 PF: > { %s15_s22 = sadd.s32 1, %s1939_s22   ;;  %s2793_s18 = smov %s1931_s20 }
 0x1b5   : > { %p12_p9 = scmp.ge.s32.totalorder %s15_s22, 6   ;;  %s2794_s19 = smov %s1935_s21 }
 0x1b6   : > { %s2795_s20 = smov %s2798_s23  ;;  %s2796_s21 = smov %s2802_s24 }
 0x1b7   :  { %14 = sbr.rel (!%p12_p9) target bundleno = 3 (0x3), region = 78 }

</bundles_post_ra>
